<compile_context>
chip_gen: v7x
topology: tpu7x:2x2x1
jax: 0.10.0
libtpu: 0.0.40
codegen_flags: <defaults>
</compile_context>

<pallas_src>
import math
from functools import partial

import jax
import jax.numpy as jnp
from jax import lax
from jax.experimental import pallas as pl
from jax.experimental.pallas import tpu as pltpu

# ---- config (mirrors the BertConfig fields the module reads) ----
HIDDEN = 32          # config.hidden_size
EXPAND = 2           # config.expand
HEADDIM = 16         # config.headdim
QK_DIM = 16          # config.qk_dim
D_CONV = 4           # config.d_conv
N_LAYERS = 2         # config.num_hidden_layers
IS_PRENORM = False   # config.is_prenorm
LN_EPS = 1e-5

D_INNER = EXPAND * HIDDEN
N_HEADS = D_INNER // HEADDIM
SCALE = 1.0 / math.sqrt(QK_DIM)


def _silu(x):
    return x * jax.nn.sigmoid(x)


# ----------------------------------------------------------------------------
# Fused Pallas kernel: all N_LAYERS BertUnpadMixer layers for one batch block.
#   x_ref      : (R, D)        flattened (batch_block*S, hidden) activations
#   m_ref      : (R, 1)        padding mask (1 = real token)
#   cmask_ref  : (D_CONV-1, R, 1)   causal-conv edge masks (per shift)
#   bias_ref   : (R, R)        additive attention bias (-1e30 across sequences)
#   weights    : shared across layers (reference deepcopies one BertLayer)
#   out_ref    : (N_LAYERS, R, D)   per-layer outputs
#   y_sc       : (R, D_INNER) VMEM scratch for the head-mixing result
# ----------------------------------------------------------------------------
def encoder_kernel(x_ref, m_ref, cmask_ref, bias_ref,
                   wz_ref, wx_ref, cw_ref, cb_ref, wq_ref, wk_ref, wo_ref,
                   g_ref, b_ref, out_ref, y_sc):
    # hoisted loads / broadcasts (used by every layer iteration)
    m = m_ref[...]              # (R, 1)
    bias = bias_ref[...]        # (R, R)
    conv_b = cb_ref[...]        # (1, D_INNER)
    ln_g = g_ref[...]           # (1, D)
    ln_b = b_ref[...]           # (1, D)

    # pad_input(unpad_input(hidden_states)) == zero out padded rows
    x = x_ref[...] * m          # (R, D)

    for layer in range(N_LAYERS):          # layers fused; params are shared
        # --- mixer: lane-aligned split input projection -> z, x ---
        z = jnp.dot(x, wz_ref[...], preferred_element_type=jnp.float32)    # (R, Di)
        xi = jnp.dot(x, wx_ref[...], preferred_element_type=jnp.float32)   # (R, Di)

        # --- depthwise causal conv along the sequence axis of each sequence ---
        acc = xi * cw_ref[D_CONV - 1] + conv_b
        for k in range(D_CONV - 1):
            shift = D_CONV - 1 - k
            shifted = pltpu.roll(xi, shift=shift, axis=0) * cmask_ref[k]
            acc = acc + shifted * cw_ref[k]
        xi = _silu(acc)

        # --- batched per-head Q/K projections via block-diagonal weights ---
        q_all = jnp.dot(xi, wq_ref[...], preferred_element_type=jnp.float32)  # (R, H*qk)
        k_all = jnp.dot(xi, wk_ref[...], preferred_element_type=jnp.float32)  # (R, H*qk)

        # --- per-head data-dependent (attention-style) matrix mixing ---
        for h in range(N_HEADS):
            lo_qk = h * QK_DIM
            qh = q_all[:, lo_qk:lo_qk + QK_DIM]                   # (R, qk)
            kh = k_all[:, lo_qk:lo_qk + QK_DIM]                   # (R, qk)
            s = jnp.dot(qh, kh.T, preferred_element_type=jnp.float32) * SCALE + bias
            s = s - jnp.max(s, axis=-1, keepdims=True)
            p = jnp.exp(s)
            p = p * pl.reciprocal(jnp.sum(p, axis=-1, keepdims=True), approx=True)
            lo_hd = h * HEADDIM
            xh = xi[:, lo_hd:lo_hd + HEADDIM]                     # (R, hd)
            # write head result into its lane slice (no concatenate)
            y_sc[:, lo_hd:lo_hd + HEADDIM] = jnp.dot(
                p, xh, preferred_element_type=jnp.float32)

        # --- gate + output projection ---
        y = y_sc[...] * _silu(z)
        mix = jnp.dot(y, wo_ref[...], preferred_element_type=jnp.float32)   # (R, D)

        # --- unpad_input_only (mask) + residual + post LayerNorm ---
        out = mix * m + x
        mu = jnp.mean(out, axis=-1, keepdims=True)
        var = jnp.mean((out - mu) ** 2, axis=-1, keepdims=True)
        out = (out - mu) * lax.rsqrt(var + LN_EPS) * ln_g + ln_b
        x = out * m            # re-apply pad mask (== pad_input of layer output)

        out_ref[layer] = x.astype(out_ref.dtype)


def _block_diag(w):
    """(H, in, out) -> block-diagonal (H*in, H*out)."""
    H, din, dout = w.shape
    out = jnp.zeros((H * din, H * dout), w.dtype)
    for h in range(H):
        out = out.at[h * din:(h + 1) * din, h * dout:(h + 1) * dout].set(w[h])
    return out


@partial(jax.jit, static_argnames=("output_all_encoded_layers",))
def bert_encoder_forward(hidden_states, attention_mask, params,
                         output_all_encoded_layers=False):
    """BertEncoder.forward (subset_mask=None).  Returns list of encoded layers."""
    B, S, D = hidden_states.shape
    assert D == HIDDEN

    # Collapse the batch into a single grid step (best on single-TC v5e/v6e).
    # On v7x (2 TCs) one would set batch_block = B // 2 so the "parallel" grid
    # axis is split across both cores.
    batch_block = B
    n_blocks = B // batch_block
    R = batch_block * S

    # flatten (B, S, D) -> (B*S, D): more sublanes per store, one block per grid step
    x2d = hidden_states.reshape(B * S, D)
    mask2d = attention_mask.astype(hidden_states.dtype).reshape(B * S, 1)

    # host-precomputed constant masks (hoisted out of the kernel)
    pos = jnp.arange(R) % S                                   # position within sequence
    conv_mask = jnp.stack(
        [(pos >= (D_CONV - 1 - k)).astype(jnp.float32) for k in range(D_CONV - 1)]
    )[..., None]                                              # (D_CONV-1, R, 1)
    seq_id = jnp.arange(R) // S
    attn_bias = jnp.where(seq_id[:, None] == seq_id[None, :], 0.0, -1e30
                          ).astype(jnp.float32)               # (R, R)

    # split in_proj (lane-aligned) and block-diagonalize per-head Q/K weights (host side)
    w_in_z = params["w_in"][:, :D_INNER]
    w_in_x = params["w_in"][:, D_INNER:]
    wq_bd = _block_diag(params["wq"])                         # (D_INNER, H*qk)
    wk_bd = _block_diag(params["wk"])                         # (D_INNER, H*qk)

    full = lambda *_: tuple(0 for _ in _)  # noqa: E731 (unused; clarity only)

    out = pl.pallas_call(
        encoder_kernel,
        out_shape=jax.ShapeDtypeStruct((N_LAYERS, B * S, D), hidden_states.dtype),
        grid_spec=pltpu.PrefetchScalarGridSpec(
            num_scalar_prefetch=0,
            grid=(n_blocks,),
            in_specs=[
                pl.BlockSpec((R, D), lambda b: (b, 0)),                        # x
                pl.BlockSpec((R, 1), lambda b: (b, 0)),                        # mask
                pl.BlockSpec((D_CONV - 1, R, 1), lambda b: (0, 0, 0)),         # conv mask
                pl.BlockSpec((R, R), lambda b: (0, 0)),                        # attn bias
                pl.BlockSpec((D, D_INNER), lambda b: (0, 0)),                  # w_in_z
                pl.BlockSpec((D, D_INNER), lambda b: (0, 0)),                  # w_in_x
                pl.BlockSpec((D_CONV, D_INNER), lambda b: (0, 0)),             # conv_w
                pl.BlockSpec((1, D_INNER), lambda b: (0, 0)),                  # conv_b
                pl.BlockSpec((D_INNER, N_HEADS * QK_DIM), lambda b: (0, 0)),   # wq (bd)
                pl.BlockSpec((D_INNER, N_HEADS * QK_DIM), lambda b: (0, 0)),   # wk (bd)
                pl.BlockSpec((D_INNER, D), lambda b: (0, 0)),                  # w_out
                pl.BlockSpec((1, D), lambda b: (0, 0)),                        # ln gamma
                pl.BlockSpec((1, D), lambda b: (0, 0)),                        # ln beta
            ],
            out_specs=pl.BlockSpec((N_LAYERS, R, D), lambda b: (0, b, 0)),
            scratch_shapes=[pltpu.VMEM((R, D_INNER), jnp.float32)],
        ),
        compiler_params=pltpu.CompilerParams(dimension_semantics=("parallel",)),
    )(x2d, mask2d, conv_mask, attn_bias, w_in_z, w_in_x,
      params["conv_w"], params["conv_b"], wq_bd, wk_bd,
      params["w_out"], params["ln_g"], params["ln_b"])

    per_layer = out.reshape(N_LAYERS, B, S, D)
    if output_all_encoded_layers:
        return [per_layer[l] for l in range(N_LAYERS)]
    return [per_layer[-1]]


def init_params(key):
    ks = jax.random.split(key, 5)
    s = 0.1
    return {
        "w_in": jax.random.normal(ks[0], (HIDDEN, 2 * D_INNER), jnp.float32) * s,
        "conv_w": jax.random.normal(ks[1], (D_CONV, D_INNER), jnp.float32) * s,
        "conv_b": jnp.zeros((1, D_INNER), jnp.float32),
        "wq": jax.random.normal(ks[2], (N_HEADS, HEADDIM, QK_DIM), jnp.float32) * s,
        "wk": jax.random.normal(ks[3], (N_HEADS, HEADDIM, QK_DIM), jnp.float32) * s,
        "w_out": jax.random.normal(ks[4], (D_INNER, HIDDEN), jnp.float32) * s,
        "ln_g": jnp.ones((1, HIDDEN), jnp.float32),
        "ln_b": jnp.zeros((1, HIDDEN), jnp.float32),
    }


# ---- pure-JAX reference of the same layer (for the correctness check) ----
def _layer_ref(x, mask, p):
    B, S, _ = x.shape
    m = mask[..., None]
    xz = x @ p["w_in"]
    z, xi = xz[..., :D_INNER], xz[..., D_INNER:]
    xpad = jnp.pad(xi, ((0, 0), (D_CONV - 1, 0), (0, 0)))
    acc = sum(xpad[:, k:k + S, :] * p["conv_w"][k] for k in range(D_CONV))
    xi = jax.nn.silu(acc + p["conv_b"][0])
    xh = xi.reshape(B, S, N_HEADS, HEADDIM)
    q = jnp.einsum('bshd,hde->bshe', xh, p["wq"])
    k = jnp.einsum('bshd,hde->bshe', xh, p["wk"])
    s = jnp.einsum('bshe,bthe->bhst', q, k) / (QK_DIM ** 0.5)
    pr = jax.nn.softmax(s, axis=-1)
    y = jnp.einsum('bhst,bthd->bshd', pr, xh).reshape(B, S, D_INNER)
    y = y * jax.nn.silu(z)
    out = (y @ p["w_out"]) * m + x
    mu = out.mean(-1, keepdims=True)
    var = ((out - mu) ** 2).mean(-1, keepdims=True)
    out = (out - mu) / jnp.sqrt(var + LN_EPS) * p["ln_g"][0] + p["ln_b"][0]
    return out * m


if __name__ == "__main__":
    B, S = 2, 8
    key = jax.random.PRNGKey(0)
    k_x, k_p = jax.random.split(key)
    hidden_states = jax.random.normal(k_x, (B, S, HIDDEN), jnp.float32)
    # second sequence has 3 padded tokens
    attention_mask = jnp.array([[1] * 8, [1] * 5 + [0] * 3], jnp.float32)
    params = init_params(k_p)

    outs = bert_encoder_forward(hidden_states, attention_mask, params,
                                output_all_encoded_layers=False)
    final = jax.block_until_ready(outs[-1])

    # sanity check against a pure-JAX reference of the identical math
    ref = hidden_states * attention_mask[..., None]
    for _ in range(N_LAYERS):
        ref = _layer_ref(ref, attention_mask, params)
    assert final.shape == (B, S, HIDDEN)
    assert bool(jnp.allclose(final, ref, atol=1e-2, rtol=1e-2)), "mismatch vs reference"
    print("KERNEL_OK")
</pallas_src>

<mosaic_0001>
module attributes {stable_mosaic.version = 11 : i64} {
  func.func @encoder_kernel(%arg0: i32, %arg1: memref<16x32xf32, #tpu.memory_space<vmem>>, %arg2: memref<16x1xf32, #tpu.memory_space<vmem>>, %arg3: memref<3x16x1xf32, #tpu.memory_space<vmem>>, %arg4: memref<16x16xf32, #tpu.memory_space<vmem>>, %arg5: memref<32x64xf32, #tpu.memory_space<vmem>>, %arg6: memref<32x64xf32, #tpu.memory_space<vmem>>, %arg7: memref<4x64xf32, #tpu.memory_space<vmem>>, %arg8: memref<1x64xf32, #tpu.memory_space<vmem>>, %arg9: memref<64x64xf32, #tpu.memory_space<vmem>>, %arg10: memref<64x64xf32, #tpu.memory_space<vmem>>, %arg11: memref<64x32xf32, #tpu.memory_space<vmem>>, %arg12: memref<1x32xf32, #tpu.memory_space<vmem>>, %arg13: memref<1x32xf32, #tpu.memory_space<vmem>>, %arg14: memref<2x16x32xf32, #tpu.memory_space<vmem>>, %arg15: memref<16x64xf32, #tpu.memory_space<vmem>>) attributes {dimension_semantics = [#tpu.dimension_semantics<parallel>], iteration_bounds = array<i64: 1>, scalar_prefetch = 0 : i64, scratch_operands = 1 : i64, tpu.core_type = #tpu.core_type<tc>, window_params = [{transform_indices = @transform_0, window_bounds = array<i64: 16, 32>}, {transform_indices = @transform_1, window_bounds = array<i64: 16, 1>}, {pipeline_mode = #tpu.pipeline_mode<synchronous>, transform_indices = @transform_2, window_bounds = array<i64: 3, 16, 1>}, {pipeline_mode = #tpu.pipeline_mode<synchronous>, transform_indices = @transform_3, window_bounds = array<i64: 16, 16>}, {pipeline_mode = #tpu.pipeline_mode<synchronous>, transform_indices = @transform_4, window_bounds = array<i64: 32, 64>}, {pipeline_mode = #tpu.pipeline_mode<synchronous>, transform_indices = @transform_5, window_bounds = array<i64: 32, 64>}, {pipeline_mode = #tpu.pipeline_mode<synchronous>, transform_indices = @transform_6, window_bounds = array<i64: 4, 64>}, {pipeline_mode = #tpu.pipeline_mode<synchronous>, transform_indices = @transform_7, window_bounds = array<i64: 1, 64>}, {pipeline_mode = #tpu.pipeline_mode<synchronous>, transform_indices = @transform_8, window_bounds = array<i64: 64, 64>}, {pipeline_mode = #tpu.pipeline_mode<synchronous>, transform_indices = @transform_9, window_bounds = array<i64: 64, 64>}, {pipeline_mode = #tpu.pipeline_mode<synchronous>, transform_indices = @transform_10, window_bounds = array<i64: 64, 32>}, {pipeline_mode = #tpu.pipeline_mode<synchronous>, transform_indices = @transform_11, window_bounds = array<i64: 1, 32>}, {pipeline_mode = #tpu.pipeline_mode<synchronous>, transform_indices = @transform_12, window_bounds = array<i64: 1, 32>}, {transform_indices = @transform_13, window_bounds = array<i64: 2, 16, 32>}]} {
    %c0 = arith.constant 0 : index
    %c0_0 = arith.constant 0 : index
    %0 = vector.load %arg2[%c0, %c0_0] : memref<16x1xf32, #tpu.memory_space<vmem>>, vector<16x1xf32>
    %c0_1 = arith.constant 0 : index
    %c0_2 = arith.constant 0 : index
    %1 = vector.load %arg4[%c0_1, %c0_2] : memref<16x16xf32, #tpu.memory_space<vmem>>, vector<16x16xf32>
    %c0_3 = arith.constant 0 : index
    %c0_4 = arith.constant 0 : index
    %2 = vector.load %arg8[%c0_3, %c0_4] : memref<1x64xf32, #tpu.memory_space<vmem>>, vector<1x64xf32>
    %c0_5 = arith.constant 0 : index
    %c0_6 = arith.constant 0 : index
    %3 = vector.load %arg12[%c0_5, %c0_6] : memref<1x32xf32, #tpu.memory_space<vmem>>, vector<1x32xf32>
    %c0_7 = arith.constant 0 : index
    %c0_8 = arith.constant 0 : index
    %4 = vector.load %arg13[%c0_7, %c0_8] : memref<1x32xf32, #tpu.memory_space<vmem>>, vector<1x32xf32>
    %c0_9 = arith.constant 0 : index
    %c0_10 = arith.constant 0 : index
    %5 = vector.load %arg1[%c0_9, %c0_10] : memref<16x32xf32, #tpu.memory_space<vmem>>, vector<16x32xf32>
    %6 = vector.broadcast %0 : vector<16x1xf32> to vector<16x32xf32>
    %7 = arith.mulf %5, %6 : vector<16x32xf32>
    %c0_11 = arith.constant 0 : index
    %c0_12 = arith.constant 0 : index
    %8 = vector.load %arg5[%c0_11, %c0_12] : memref<32x64xf32, #tpu.memory_space<vmem>>, vector<32x64xf32>
    %cst = arith.constant dense<0.000000e+00> : vector<16x64xf32>
    %9 = tpu.matmul %7, %8, %cst {dimension_numbers = #tpu.dot_dimension_numbers<[1], [0], [0], [1], [0, 0, 1, 1], [], []>} : vector<16x32xf32>, vector<32x64xf32>, vector<16x64xf32> -> vector<16x64xf32>
    %c0_13 = arith.constant 0 : index
    %c0_14 = arith.constant 0 : index
    %10 = vector.load %arg6[%c0_13, %c0_14] : memref<32x64xf32, #tpu.memory_space<vmem>>, vector<32x64xf32>
    %cst_15 = arith.constant dense<0.000000e+00> : vector<16x64xf32>
    %11 = tpu.matmul %7, %10, %cst_15 {dimension_numbers = #tpu.dot_dimension_numbers<[1], [0], [0], [1], [0, 0, 1, 1], [], []>} : vector<16x32xf32>, vector<32x64xf32>, vector<16x64xf32> -> vector<16x64xf32>
    %c3 = arith.constant 3 : index
    %c0_16 = arith.constant 0 : index
    %12 = vector.load %arg7[%c3, %c0_16] : memref<4x64xf32, #tpu.memory_space<vmem>>, vector<1x64xf32>
    %13 = vector.shape_cast %12 : vector<1x64xf32> to vector<64xf32>
    %14 = vector.shape_cast %13 : vector<64xf32> to vector<1x64xf32>
    %15 = vector.broadcast %14 : vector<1x64xf32> to vector<16x64xf32>
    %16 = arith.mulf %11, %15 : vector<16x64xf32>
    %17 = vector.broadcast %2 : vector<1x64xf32> to vector<16x64xf32>
    %18 = arith.addf %16, %17 : vector<16x64xf32>
    %c3_i32 = arith.constant 3 : i32
    %19 = tpu.dynamic_rotate %11 by %c3_i32 dim 0 : vector<16x64xf32>, i32 -> vector<16x64xf32>
    %c0_17 = arith.constant 0 : index
    %c0_18 = arith.constant 0 : index
    %c0_19 = arith.constant 0 : index
    %20 = vector.load %arg3[%c0_17, %c0_18, %c0_19] : memref<3x16x1xf32, #tpu.memory_space<vmem>>, vector<1x16x1xf32>
    %21 = vector.shape_cast %20 : vector<1x16x1xf32> to vector<16x1xf32>
    %22 = vector.broadcast %21 : vector<16x1xf32> to vector<16x64xf32>
    %23 = arith.mulf %19, %22 : vector<16x64xf32>
    %c0_20 = arith.constant 0 : index
    %c0_21 = arith.constant 0 : index
    %24 = vector.load %arg7[%c0_20, %c0_21] : memref<4x64xf32, #tpu.memory_space<vmem>>, vector<1x64xf32>
    %25 = vector.shape_cast %24 : vector<1x64xf32> to vector<64xf32>
    %26 = vector.shape_cast %25 : vector<64xf32> to vector<1x64xf32>
    %27 = vector.broadcast %26 : vector<1x64xf32> to vector<16x64xf32>
    %28 = arith.mulf %23, %27 : vector<16x64xf32>
    %29 = arith.addf %18, %28 : vector<16x64xf32>
    %c2_i32 = arith.constant 2 : i32
    %30 = tpu.dynamic_rotate %11 by %c2_i32 dim 0 : vector<16x64xf32>, i32 -> vector<16x64xf32>
    %c1 = arith.constant 1 : index
    %c0_22 = arith.constant 0 : index
    %c0_23 = arith.constant 0 : index
    %31 = vector.load %arg3[%c1, %c0_22, %c0_23] : memref<3x16x1xf32, #tpu.memory_space<vmem>>, vector<1x16x1xf32>
    %32 = vector.shape_cast %31 : vector<1x16x1xf32> to vector<16x1xf32>
    %33 = vector.broadcast %32 : vector<16x1xf32> to vector<16x64xf32>
    %34 = arith.mulf %30, %33 : vector<16x64xf32>
    %c1_24 = arith.constant 1 : index
    %c0_25 = arith.constant 0 : index
    %35 = vector.load %arg7[%c1_24, %c0_25] : memref<4x64xf32, #tpu.memory_space<vmem>>, vector<1x64xf32>
    %36 = vector.shape_cast %35 : vector<1x64xf32> to vector<64xf32>
    %37 = vector.shape_cast %36 : vector<64xf32> to vector<1x64xf32>
    %38 = vector.broadcast %37 : vector<1x64xf32> to vector<16x64xf32>
    %39 = arith.mulf %34, %38 : vector<16x64xf32>
    %40 = arith.addf %29, %39 : vector<16x64xf32>
    %c1_i32 = arith.constant 1 : i32
    %41 = tpu.dynamic_rotate %11 by %c1_i32 dim 0 : vector<16x64xf32>, i32 -> vector<16x64xf32>
    %c2 = arith.constant 2 : index
    %c0_26 = arith.constant 0 : index
    %c0_27 = arith.constant 0 : index
    %42 = vector.load %arg3[%c2, %c0_26, %c0_27] : memref<3x16x1xf32, #tpu.memory_space<vmem>>, vector<1x16x1xf32>
    %43 = vector.shape_cast %42 : vector<1x16x1xf32> to vector<16x1xf32>
    %44 = vector.broadcast %43 : vector<16x1xf32> to vector<16x64xf32>
    %45 = arith.mulf %41, %44 : vector<16x64xf32>
    %c2_28 = arith.constant 2 : index
    %c0_29 = arith.constant 0 : index
    %46 = vector.load %arg7[%c2_28, %c0_29] : memref<4x64xf32, #tpu.memory_space<vmem>>, vector<1x64xf32>
    %47 = vector.shape_cast %46 : vector<1x64xf32> to vector<64xf32>
    %48 = vector.shape_cast %47 : vector<64xf32> to vector<1x64xf32>
    %49 = vector.broadcast %48 : vector<1x64xf32> to vector<16x64xf32>
    %50 = arith.mulf %45, %49 : vector<16x64xf32>
    %51 = arith.addf %40, %50 : vector<16x64xf32>
    %52 = arith.negf %51 : vector<16x64xf32>
    %53 = math.exp %52 : vector<16x64xf32>
    %cst_30 = arith.constant 1.000000e+00 : f32
    %54 = vector.broadcast %cst_30 : f32 to vector<16x64xf32>
    %55 = arith.addf %54, %53 : vector<16x64xf32>
    %56 = arith.divf %54, %55 : vector<16x64xf32>
    %57 = arith.mulf %51, %56 : vector<16x64xf32>
    %c0_31 = arith.constant 0 : index
    %c0_32 = arith.constant 0 : index
    %58 = vector.load %arg9[%c0_31, %c0_32] : memref<64x64xf32, #tpu.memory_space<vmem>>, vector<64x64xf32>
    %cst_33 = arith.constant dense<0.000000e+00> : vector<16x64xf32>
    %59 = tpu.matmul %57, %58, %cst_33 {dimension_numbers = #tpu.dot_dimension_numbers<[1], [0], [0], [1], [0, 0, 1, 1], [], []>} : vector<16x64xf32>, vector<64x64xf32>, vector<16x64xf32> -> vector<16x64xf32>
    %c0_34 = arith.constant 0 : index
    %c0_35 = arith.constant 0 : index
    %60 = vector.load %arg10[%c0_34, %c0_35] : memref<64x64xf32, #tpu.memory_space<vmem>>, vector<64x64xf32>
    %cst_36 = arith.constant dense<0.000000e+00> : vector<16x64xf32>
    %61 = tpu.matmul %57, %60, %cst_36 {dimension_numbers = #tpu.dot_dimension_numbers<[1], [0], [0], [1], [0, 0, 1, 1], [], []>} : vector<16x64xf32>, vector<64x64xf32>, vector<16x64xf32> -> vector<16x64xf32>
    %62 = vector.extract_strided_slice %59 {offsets = [0, 0], sizes = [16, 16], strides = [1, 1]} : vector<16x64xf32> to vector<16x16xf32>
    %63 = vector.extract_strided_slice %61 {offsets = [0, 0], sizes = [16, 16], strides = [1, 1]} : vector<16x64xf32> to vector<16x16xf32>
    %64 = tpu.transpose %63, [1, 0] : vector<16x16xf32> -> vector<16x16xf32>
    %cst_37 = arith.constant dense<0.000000e+00> : vector<16x16xf32>
    %65 = tpu.matmul %62, %64, %cst_37 {dimension_numbers = #tpu.dot_dimension_numbers<[1], [0], [0], [1], [0, 0, 1, 1], [], []>} : vector<16x16xf32>, vector<16x16xf32>, vector<16x16xf32> -> vector<16x16xf32>
    %cst_38 = arith.constant 2.500000e-01 : f32
    %66 = vector.broadcast %cst_38 : f32 to vector<16x16xf32>
    %67 = arith.mulf %65, %66 : vector<16x16xf32>
    %68 = arith.addf %67, %1 : vector<16x16xf32>
    %cst_39 = arith.constant dense<0xFF800000> : vector<16xf32>
    %69 = vector.multi_reduction <maximumf>, %68, %cst_39 [1] : vector<16x16xf32> to vector<16xf32>
    %70 = vector.shape_cast %69 : vector<16xf32> to vector<16x1xf32>
    %71 = vector.broadcast %70 : vector<16x1xf32> to vector<16x16xf32>
    %72 = arith.subf %68, %71 : vector<16x16xf32>
    %73 = math.exp %72 : vector<16x16xf32>
    %cst_40 = arith.constant dense<0.000000e+00> : vector<16xf32>
    %74 = vector.multi_reduction <add>, %73, %cst_40 [1] : vector<16x16xf32> to vector<16xf32>
    %75 = vector.shape_cast %74 : vector<16xf32> to vector<16x1xf32>
    %76 = tpu.reciprocal %75 {approx = true} : vector<16x1xf32> -> vector<16x1xf32>
    %77 = vector.broadcast %76 : vector<16x1xf32> to vector<16x16xf32>
    %78 = arith.mulf %73, %77 : vector<16x16xf32>
    %79 = vector.extract_strided_slice %57 {offsets = [0, 0], sizes = [16, 16], strides = [1, 1]} : vector<16x64xf32> to vector<16x16xf32>
    %cst_41 = arith.constant dense<0.000000e+00> : vector<16x16xf32>
    %80 = tpu.matmul %78, %79, %cst_41 {dimension_numbers = #tpu.dot_dimension_numbers<[1], [0], [0], [1], [0, 0, 1, 1], [], []>} : vector<16x16xf32>, vector<16x16xf32>, vector<16x16xf32> -> vector<16x16xf32>
    %c0_42 = arith.constant 0 : index
    %c0_43 = arith.constant 0 : index
    %81 = vector.load %arg15[%c0_42, %c0_43] : memref<16x64xf32, #tpu.memory_space<vmem>>, vector<16x16xf32>
    tpu.vector_store %arg15[%c0_42, %c0_43], %80 {strides = array<i32>} : memref<16x64xf32, #tpu.memory_space<vmem>>, vector<16x16xf32>,
    %82 = vector.extract_strided_slice %59 {offsets = [0, 16], sizes = [16, 16], strides = [1, 1]} : vector<16x64xf32> to vector<16x16xf32>
    %83 = vector.extract_strided_slice %61 {offsets = [0, 16], sizes = [16, 16], strides = [1, 1]} : vector<16x64xf32> to vector<16x16xf32>
    %84 = tpu.transpose %83, [1, 0] : vector<16x16xf32> -> vector<16x16xf32>
    %cst_44 = arith.constant dense<0.000000e+00> : vector<16x16xf32>
    %85 = tpu.matmul %82, %84, %cst_44 {dimension_numbers = #tpu.dot_dimension_numbers<[1], [0], [0], [1], [0, 0, 1, 1], [], []>} : vector<16x16xf32>, vector<16x16xf32>, vector<16x16xf32> -> vector<16x16xf32>
    %cst_45 = arith.constant 2.500000e-01 : f32
    %86 = vector.broadcast %cst_45 : f32 to vector<16x16xf32>
    %87 = arith.mulf %85, %86 : vector<16x16xf32>
    %88 = arith.addf %87, %1 : vector<16x16xf32>
    %cst_46 = arith.constant dense<0xFF800000> : vector<16xf32>
    %89 = vector.multi_reduction <maximumf>, %88, %cst_46 [1] : vector<16x16xf32> to vector<16xf32>
    %90 = vector.shape_cast %89 : vector<16xf32> to vector<16x1xf32>
    %91 = vector.broadcast %90 : vector<16x1xf32> to vector<16x16xf32>
    %92 = arith.subf %88, %91 : vector<16x16xf32>
    %93 = math.exp %92 : vector<16x16xf32>
    %cst_47 = arith.constant dense<0.000000e+00> : vector<16xf32>
    %94 = vector.multi_reduction <add>, %93, %cst_47 [1] : vector<16x16xf32> to vector<16xf32>
    %95 = vector.shape_cast %94 : vector<16xf32> to vector<16x1xf32>
    %96 = tpu.reciprocal %95 {approx = true} : vector<16x1xf32> -> vector<16x1xf32>
    %97 = vector.broadcast %96 : vector<16x1xf32> to vector<16x16xf32>
    %98 = arith.mulf %93, %97 : vector<16x16xf32>
    %99 = vector.extract_strided_slice %57 {offsets = [0, 16], sizes = [16, 16], strides = [1, 1]} : vector<16x64xf32> to vector<16x16xf32>
    %cst_48 = arith.constant dense<0.000000e+00> : vector<16x16xf32>
    %100 = tpu.matmul %98, %99, %cst_48 {dimension_numbers = #tpu.dot_dimension_numbers<[1], [0], [0], [1], [0, 0, 1, 1], [], []>} : vector<16x16xf32>, vector<16x16xf32>, vector<16x16xf32> -> vector<16x16xf32>
    %c0_49 = arith.constant 0 : index
    %c16 = arith.constant 16 : index
    %101 = vector.load %arg15[%c0_49, %c16] : memref<16x64xf32, #tpu.memory_space<vmem>>, vector<16x16xf32>
    tpu.vector_store %arg15[%c0_49, %c16], %100 {strides = array<i32>} : memref<16x64xf32, #tpu.memory_space<vmem>>, vector<16x16xf32>,
    %102 = vector.extract_strided_slice %59 {offsets = [0, 32], sizes = [16, 16], strides = [1, 1]} : vector<16x64xf32> to vector<16x16xf32>
    %103 = vector.extract_strided_slice %61 {offsets = [0, 32], sizes = [16, 16], strides = [1, 1]} : vector<16x64xf32> to vector<16x16xf32>
    %104 = tpu.transpose %103, [1, 0] : vector<16x16xf32> -> vector<16x16xf32>
    %cst_50 = arith.constant dense<0.000000e+00> : vector<16x16xf32>
    %105 = tpu.matmul %102, %104, %cst_50 {dimension_numbers = #tpu.dot_dimension_numbers<[1], [0], [0], [1], [0, 0, 1, 1], [], []>} : vector<16x16xf32>, vector<16x16xf32>, vector<16x16xf32> -> vector<16x16xf32>
    %cst_51 = arith.constant 2.500000e-01 : f32
    %106 = vector.broadcast %cst_51 : f32 to vector<16x16xf32>
    %107 = arith.mulf %105, %106 : vector<16x16xf32>
    %108 = arith.addf %107, %1 : vector<16x16xf32>
    %cst_52 = arith.constant dense<0xFF800000> : vector<16xf32>
    %109 = vector.multi_reduction <maximumf>, %108, %cst_52 [1] : vector<16x16xf32> to vector<16xf32>
    %110 = vector.shape_cast %109 : vector<16xf32> to vector<16x1xf32>
    %111 = vector.broadcast %110 : vector<16x1xf32> to vector<16x16xf32>
    %112 = arith.subf %108, %111 : vector<16x16xf32>
    %113 = math.exp %112 : vector<16x16xf32>
    %cst_53 = arith.constant dense<0.000000e+00> : vector<16xf32>
    %114 = vector.multi_reduction <add>, %113, %cst_53 [1] : vector<16x16xf32> to vector<16xf32>
    %115 = vector.shape_cast %114 : vector<16xf32> to vector<16x1xf32>
    %116 = tpu.reciprocal %115 {approx = true} : vector<16x1xf32> -> vector<16x1xf32>
    %117 = vector.broadcast %116 : vector<16x1xf32> to vector<16x16xf32>
    %118 = arith.mulf %113, %117 : vector<16x16xf32>
    %119 = vector.extract_strided_slice %57 {offsets = [0, 32], sizes = [16, 16], strides = [1, 1]} : vector<16x64xf32> to vector<16x16xf32>
    %cst_54 = arith.constant dense<0.000000e+00> : vector<16x16xf32>
    %120 = tpu.matmul %118, %119, %cst_54 {dimension_numbers = #tpu.dot_dimension_numbers<[1], [0], [0], [1], [0, 0, 1, 1], [], []>} : vector<16x16xf32>, vector<16x16xf32>, vector<16x16xf32> -> vector<16x16xf32>
    %c0_55 = arith.constant 0 : index
    %c32 = arith.constant 32 : index
    %121 = vector.load %arg15[%c0_55, %c32] : memref<16x64xf32, #tpu.memory_space<vmem>>, vector<16x16xf32>
    tpu.vector_store %arg15[%c0_55, %c32], %120 {strides = array<i32>} : memref<16x64xf32, #tpu.memory_space<vmem>>, vector<16x16xf32>,
    %122 = vector.extract_strided_slice %59 {offsets = [0, 48], sizes = [16, 16], strides = [1, 1]} : vector<16x64xf32> to vector<16x16xf32>
    %123 = vector.extract_strided_slice %61 {offsets = [0, 48], sizes = [16, 16], strides = [1, 1]} : vector<16x64xf32> to vector<16x16xf32>
    %124 = tpu.transpose %123, [1, 0] : vector<16x16xf32> -> vector<16x16xf32>
    %cst_56 = arith.constant dense<0.000000e+00> : vector<16x16xf32>
    %125 = tpu.matmul %122, %124, %cst_56 {dimension_numbers = #tpu.dot_dimension_numbers<[1], [0], [0], [1], [0, 0, 1, 1], [], []>} : vector<16x16xf32>, vector<16x16xf32>, vector<16x16xf32> -> vector<16x16xf32>
    %cst_57 = arith.constant 2.500000e-01 : f32
    %126 = vector.broadcast %cst_57 : f32 to vector<16x16xf32>
    %127 = arith.mulf %125, %126 : vector<16x16xf32>
    %128 = arith.addf %127, %1 : vector<16x16xf32>
    %cst_58 = arith.constant dense<0xFF800000> : vector<16xf32>
    %129 = vector.multi_reduction <maximumf>, %128, %cst_58 [1] : vector<16x16xf32> to vector<16xf32>
    %130 = vector.shape_cast %129 : vector<16xf32> to vector<16x1xf32>
    %131 = vector.broadcast %130 : vector<16x1xf32> to vector<16x16xf32>
    %132 = arith.subf %128, %131 : vector<16x16xf32>
    %133 = math.exp %132 : vector<16x16xf32>
    %cst_59 = arith.constant dense<0.000000e+00> : vector<16xf32>
    %134 = vector.multi_reduction <add>, %133, %cst_59 [1] : vector<16x16xf32> to vector<16xf32>
    %135 = vector.shape_cast %134 : vector<16xf32> to vector<16x1xf32>
    %136 = tpu.reciprocal %135 {approx = true} : vector<16x1xf32> -> vector<16x1xf32>
    %137 = vector.broadcast %136 : vector<16x1xf32> to vector<16x16xf32>
    %138 = arith.mulf %133, %137 : vector<16x16xf32>
    %139 = vector.extract_strided_slice %57 {offsets = [0, 48], sizes = [16, 16], strides = [1, 1]} : vector<16x64xf32> to vector<16x16xf32>
    %cst_60 = arith.constant dense<0.000000e+00> : vector<16x16xf32>
    %140 = tpu.matmul %138, %139, %cst_60 {dimension_numbers = #tpu.dot_dimension_numbers<[1], [0], [0], [1], [0, 0, 1, 1], [], []>} : vector<16x16xf32>, vector<16x16xf32>, vector<16x16xf32> -> vector<16x16xf32>
    %c0_61 = arith.constant 0 : index
    %c48 = arith.constant 48 : index
    %141 = vector.load %arg15[%c0_61, %c48] : memref<16x64xf32, #tpu.memory_space<vmem>>, vector<16x16xf32>
    tpu.vector_store %arg15[%c0_61, %c48], %140 {strides = array<i32>} : memref<16x64xf32, #tpu.memory_space<vmem>>, vector<16x16xf32>,
    %c0_62 = arith.constant 0 : index
    %c0_63 = arith.constant 0 : index
    %142 = vector.load %arg15[%c0_62, %c0_63] : memref<16x64xf32, #tpu.memory_space<vmem>>, vector<16x64xf32>
    %143 = arith.negf %9 : vector<16x64xf32>
    %144 = math.exp %143 : vector<16x64xf32>
    %cst_64 = arith.constant 1.000000e+00 : f32
    %145 = vector.broadcast %cst_64 : f32 to vector<16x64xf32>
    %146 = arith.addf %145, %144 : vector<16x64xf32>
    %147 = arith.divf %145, %146 : vector<16x64xf32>
    %148 = arith.mulf %9, %147 : vector<16x64xf32>
    %149 = arith.mulf %142, %148 : vector<16x64xf32>
    %c0_65 = arith.constant 0 : index
    %c0_66 = arith.constant 0 : index
    %150 = vector.load %arg11[%c0_65, %c0_66] : memref<64x32xf32, #tpu.memory_space<vmem>>, vector<64x32xf32>
    %cst_67 = arith.constant dense<0.000000e+00> : vector<16x32xf32>
    %151 = tpu.matmul %149, %150, %cst_67 {dimension_numbers = #tpu.dot_dimension_numbers<[1], [0], [0], [1], [0, 0, 1, 1], [], []>} : vector<16x64xf32>, vector<64x32xf32>, vector<16x32xf32> -> vector<16x32xf32>
    %152 = vector.broadcast %0 : vector<16x1xf32> to vector<16x32xf32>
    %153 = arith.mulf %151, %152 : vector<16x32xf32>
    %154 = arith.addf %153, %7 : vector<16x32xf32>
    %cst_68 = arith.constant dense<0.000000e+00> : vector<16xf32>
    %155 = vector.multi_reduction <add>, %154, %cst_68 [1] : vector<16x32xf32> to vector<16xf32>
    %156 = vector.shape_cast %155 : vector<16xf32> to vector<16x1xf32>
    %cst_69 = arith.constant 3.200000e+01 : f32
    %157 = vector.broadcast %cst_69 : f32 to vector<16x1xf32>
    %158 = arith.divf %156, %157 : vector<16x1xf32>
    %159 = vector.broadcast %158 : vector<16x1xf32> to vector<16x32xf32>
    %160 = arith.subf %154, %159 : vector<16x32xf32>
    %161 = arith.mulf %160, %160 : vector<16x32xf32>
    %cst_70 = arith.constant dense<0.000000e+00> : vector<16xf32>
    %162 = vector.multi_reduction <add>, %161, %cst_70 [1] : vector<16x32xf32> to vector<16xf32>
    %163 = vector.shape_cast %162 : vector<16xf32> to vector<16x1xf32>
    %cst_71 = arith.constant 3.200000e+01 : f32
    %164 = vector.broadcast %cst_71 : f32 to vector<16x1xf32>
    %165 = arith.divf %163, %164 : vector<16x1xf32>
    %166 = vector.broadcast %158 : vector<16x1xf32> to vector<16x32xf32>
    %167 = arith.subf %154, %166 : vector<16x32xf32>
    %cst_72 = arith.constant 9.99999974E-6 : f32
    %168 = vector.broadcast %cst_72 : f32 to vector<16x1xf32>
    %169 = arith.addf %165, %168 : vector<16x1xf32>
    %170 = math.rsqrt %169 : vector<16x1xf32>
    %171 = vector.broadcast %170 : vector<16x1xf32> to vector<16x32xf32>
    %172 = arith.mulf %167, %171 : vector<16x32xf32>
    %173 = vector.broadcast %3 : vector<1x32xf32> to vector<16x32xf32>
    %174 = arith.mulf %172, %173 : vector<16x32xf32>
    %175 = vector.broadcast %4 : vector<1x32xf32> to vector<16x32xf32>
    %176 = arith.addf %174, %175 : vector<16x32xf32>
    %177 = vector.broadcast %0 : vector<16x1xf32> to vector<16x32xf32>
    %178 = arith.mulf %176, %177 : vector<16x32xf32>
    %c0_73 = arith.constant 0 : index
    %c0_74 = arith.constant 0 : index
    %c0_75 = arith.constant 0 : index
    %179 = vector.load %arg14[%c0_73, %c0_74, %c0_75] : memref<2x16x32xf32, #tpu.memory_space<vmem>>, vector<1x16x32xf32>
    %180 = vector.shape_cast %179 : vector<1x16x32xf32> to vector<16x32xf32>
    %181 = vector.shape_cast %178 : vector<16x32xf32> to vector<1x16x32xf32>
    tpu.vector_store %arg14[%c0_73, %c0_74, %c0_75], %181 {strides = array<i32>} : memref<2x16x32xf32, #tpu.memory_space<vmem>>, vector<1x16x32xf32>,
    %c0_76 = arith.constant 0 : index
    %c0_77 = arith.constant 0 : index
    %182 = vector.load %arg5[%c0_76, %c0_77] : memref<32x64xf32, #tpu.memory_space<vmem>>, vector<32x64xf32>
    %cst_78 = arith.constant dense<0.000000e+00> : vector<16x64xf32>
    %183 = tpu.matmul %178, %182, %cst_78 {dimension_numbers = #tpu.dot_dimension_numbers<[1], [0], [0], [1], [0, 0, 1, 1], [], []>} : vector<16x32xf32>, vector<32x64xf32>, vector<16x64xf32> -> vector<16x64xf32>
    %c0_79 = arith.constant 0 : index
    %c0_80 = arith.constant 0 : index
    %184 = vector.load %arg6[%c0_79, %c0_80] : memref<32x64xf32, #tpu.memory_space<vmem>>, vector<32x64xf32>
    %cst_81 = arith.constant dense<0.000000e+00> : vector<16x64xf32>
    %185 = tpu.matmul %178, %184, %cst_81 {dimension_numbers = #tpu.dot_dimension_numbers<[1], [0], [0], [1], [0, 0, 1, 1], [], []>} : vector<16x32xf32>, vector<32x64xf32>, vector<16x64xf32> -> vector<16x64xf32>
    %c3_82 = arith.constant 3 : index
    %c0_83 = arith.constant 0 : index
    %186 = vector.load %arg7[%c3_82, %c0_83] : memref<4x64xf32, #tpu.memory_space<vmem>>, vector<1x64xf32>
    %187 = vector.shape_cast %186 : vector<1x64xf32> to vector<64xf32>
    %188 = vector.shape_cast %187 : vector<64xf32> to vector<1x64xf32>
    %189 = vector.broadcast %188 : vector<1x64xf32> to vector<16x64xf32>
    %190 = arith.mulf %185, %189 : vector<16x64xf32>
    %191 = vector.broadcast %2 : vector<1x64xf32> to vector<16x64xf32>
    %192 = arith.addf %190, %191 : vector<16x64xf32>
    %c3_i32_84 = arith.constant 3 : i32
    %193 = tpu.dynamic_rotate %185 by %c3_i32_84 dim 0 : vector<16x64xf32>, i32 -> vector<16x64xf32>
    %c0_85 = arith.constant 0 : index
    %c0_86 = arith.constant 0 : index
    %c0_87 = arith.constant 0 : index
    %194 = vector.load %arg3[%c0_85, %c0_86, %c0_87] : memref<3x16x1xf32, #tpu.memory_space<vmem>>, vector<1x16x1xf32>
    %195 = vector.shape_cast %194 : vector<1x16x1xf32> to vector<16x1xf32>
    %196 = vector.broadcast %195 : vector<16x1xf32> to vector<16x64xf32>
    %197 = arith.mulf %193, %196 : vector<16x64xf32>
    %c0_88 = arith.constant 0 : index
    %c0_89 = arith.constant 0 : index
    %198 = vector.load %arg7[%c0_88, %c0_89] : memref<4x64xf32, #tpu.memory_space<vmem>>, vector<1x64xf32>
    %199 = vector.shape_cast %198 : vector<1x64xf32> to vector<64xf32>
    %200 = vector.shape_cast %199 : vector<64xf32> to vector<1x64xf32>
    %201 = vector.broadcast %200 : vector<1x64xf32> to vector<16x64xf32>
    %202 = arith.mulf %197, %201 : vector<16x64xf32>
    %203 = arith.addf %192, %202 : vector<16x64xf32>
    %c2_i32_90 = arith.constant 2 : i32
    %204 = tpu.dynamic_rotate %185 by %c2_i32_90 dim 0 : vector<16x64xf32>, i32 -> vector<16x64xf32>
    %c1_91 = arith.constant 1 : index
    %c0_92 = arith.constant 0 : index
    %c0_93 = arith.constant 0 : index
    %205 = vector.load %arg3[%c1_91, %c0_92, %c0_93] : memref<3x16x1xf32, #tpu.memory_space<vmem>>, vector<1x16x1xf32>
    %206 = vector.shape_cast %205 : vector<1x16x1xf32> to vector<16x1xf32>
    %207 = vector.broadcast %206 : vector<16x1xf32> to vector<16x64xf32>
    %208 = arith.mulf %204, %207 : vector<16x64xf32>
    %c1_94 = arith.constant 1 : index
    %c0_95 = arith.constant 0 : index
    %209 = vector.load %arg7[%c1_94, %c0_95] : memref<4x64xf32, #tpu.memory_space<vmem>>, vector<1x64xf32>
    %210 = vector.shape_cast %209 : vector<1x64xf32> to vector<64xf32>
    %211 = vector.shape_cast %210 : vector<64xf32> to vector<1x64xf32>
    %212 = vector.broadcast %211 : vector<1x64xf32> to vector<16x64xf32>
    %213 = arith.mulf %208, %212 : vector<16x64xf32>
    %214 = arith.addf %203, %213 : vector<16x64xf32>
    %c1_i32_96 = arith.constant 1 : i32
    %215 = tpu.dynamic_rotate %185 by %c1_i32_96 dim 0 : vector<16x64xf32>, i32 -> vector<16x64xf32>
    %c2_97 = arith.constant 2 : index
    %c0_98 = arith.constant 0 : index
    %c0_99 = arith.constant 0 : index
    %216 = vector.load %arg3[%c2_97, %c0_98, %c0_99] : memref<3x16x1xf32, #tpu.memory_space<vmem>>, vector<1x16x1xf32>
    %217 = vector.shape_cast %216 : vector<1x16x1xf32> to vector<16x1xf32>
    %218 = vector.broadcast %217 : vector<16x1xf32> to vector<16x64xf32>
    %219 = arith.mulf %215, %218 : vector<16x64xf32>
    %c2_100 = arith.constant 2 : index
    %c0_101 = arith.constant 0 : index
    %220 = vector.load %arg7[%c2_100, %c0_101] : memref<4x64xf32, #tpu.memory_space<vmem>>, vector<1x64xf32>
    %221 = vector.shape_cast %220 : vector<1x64xf32> to vector<64xf32>
    %222 = vector.shape_cast %221 : vector<64xf32> to vector<1x64xf32>
    %223 = vector.broadcast %222 : vector<1x64xf32> to vector<16x64xf32>
    %224 = arith.mulf %219, %223 : vector<16x64xf32>
    %225 = arith.addf %214, %224 : vector<16x64xf32>
    %226 = arith.negf %225 : vector<16x64xf32>
    %227 = math.exp %226 : vector<16x64xf32>
    %cst_102 = arith.constant 1.000000e+00 : f32
    %228 = vector.broadcast %cst_102 : f32 to vector<16x64xf32>
    %229 = arith.addf %228, %227 : vector<16x64xf32>
    %230 = arith.divf %228, %229 : vector<16x64xf32>
    %231 = arith.mulf %225, %230 : vector<16x64xf32>
    %c0_103 = arith.constant 0 : index
    %c0_104 = arith.constant 0 : index
    %232 = vector.load %arg9[%c0_103, %c0_104] : memref<64x64xf32, #tpu.memory_space<vmem>>, vector<64x64xf32>
    %cst_105 = arith.constant dense<0.000000e+00> : vector<16x64xf32>
    %233 = tpu.matmul %231, %232, %cst_105 {dimension_numbers = #tpu.dot_dimension_numbers<[1], [0], [0], [1], [0, 0, 1, 1], [], []>} : vector<16x64xf32>, vector<64x64xf32>, vector<16x64xf32> -> vector<16x64xf32>
    %c0_106 = arith.constant 0 : index
    %c0_107 = arith.constant 0 : index
    %234 = vector.load %arg10[%c0_106, %c0_107] : memref<64x64xf32, #tpu.memory_space<vmem>>, vector<64x64xf32>
    %cst_108 = arith.constant dense<0.000000e+00> : vector<16x64xf32>
    %235 = tpu.matmul %231, %234, %cst_108 {dimension_numbers = #tpu.dot_dimension_numbers<[1], [0], [0], [1], [0, 0, 1, 1], [], []>} : vector<16x64xf32>, vector<64x64xf32>, vector<16x64xf32> -> vector<16x64xf32>
    %236 = vector.extract_strided_slice %233 {offsets = [0, 0], sizes = [16, 16], strides = [1, 1]} : vector<16x64xf32> to vector<16x16xf32>
    %237 = vector.extract_strided_slice %235 {offsets = [0, 0], sizes = [16, 16], strides = [1, 1]} : vector<16x64xf32> to vector<16x16xf32>
    %238 = tpu.transpose %237, [1, 0] : vector<16x16xf32> -> vector<16x16xf32>
    %cst_109 = arith.constant dense<0.000000e+00> : vector<16x16xf32>
    %239 = tpu.matmul %236, %238, %cst_109 {dimension_numbers = #tpu.dot_dimension_numbers<[1], [0], [0], [1], [0, 0, 1, 1], [], []>} : vector<16x16xf32>, vector<16x16xf32>, vector<16x16xf32> -> vector<16x16xf32>
    %cst_110 = arith.constant 2.500000e-01 : f32
    %240 = vector.broadcast %cst_110 : f32 to vector<16x16xf32>
    %241 = arith.mulf %239, %240 : vector<16x16xf32>
    %242 = arith.addf %241, %1 : vector<16x16xf32>
    %cst_111 = arith.constant dense<0xFF800000> : vector<16xf32>
    %243 = vector.multi_reduction <maximumf>, %242, %cst_111 [1] : vector<16x16xf32> to vector<16xf32>
    %244 = vector.shape_cast %243 : vector<16xf32> to vector<16x1xf32>
    %245 = vector.broadcast %244 : vector<16x1xf32> to vector<16x16xf32>
    %246 = arith.subf %242, %245 : vector<16x16xf32>
    %247 = math.exp %246 : vector<16x16xf32>
    %cst_112 = arith.constant dense<0.000000e+00> : vector<16xf32>
    %248 = vector.multi_reduction <add>, %247, %cst_112 [1] : vector<16x16xf32> to vector<16xf32>
    %249 = vector.shape_cast %248 : vector<16xf32> to vector<16x1xf32>
    %250 = tpu.reciprocal %249 {approx = true} : vector<16x1xf32> -> vector<16x1xf32>
    %251 = vector.broadcast %250 : vector<16x1xf32> to vector<16x16xf32>
    %252 = arith.mulf %247, %251 : vector<16x16xf32>
    %253 = vector.extract_strided_slice %231 {offsets = [0, 0], sizes = [16, 16], strides = [1, 1]} : vector<16x64xf32> to vector<16x16xf32>
    %cst_113 = arith.constant dense<0.000000e+00> : vector<16x16xf32>
    %254 = tpu.matmul %252, %253, %cst_113 {dimension_numbers = #tpu.dot_dimension_numbers<[1], [0], [0], [1], [0, 0, 1, 1], [], []>} : vector<16x16xf32>, vector<16x16xf32>, vector<16x16xf32> -> vector<16x16xf32>
    %c0_114 = arith.constant 0 : index
    %c0_115 = arith.constant 0 : index
    %255 = vector.load %arg15[%c0_114, %c0_115] : memref<16x64xf32, #tpu.memory_space<vmem>>, vector<16x16xf32>
    tpu.vector_store %arg15[%c0_114, %c0_115], %254 {strides = array<i32>} : memref<16x64xf32, #tpu.memory_space<vmem>>, vector<16x16xf32>,
    %256 = vector.extract_strided_slice %233 {offsets = [0, 16], sizes = [16, 16], strides = [1, 1]} : vector<16x64xf32> to vector<16x16xf32>
    %257 = vector.extract_strided_slice %235 {offsets = [0, 16], sizes = [16, 16], strides = [1, 1]} : vector<16x64xf32> to vector<16x16xf32>
    %258 = tpu.transpose %257, [1, 0] : vector<16x16xf32> -> vector<16x16xf32>
    %cst_116 = arith.constant dense<0.000000e+00> : vector<16x16xf32>
    %259 = tpu.matmul %256, %258, %cst_116 {dimension_numbers = #tpu.dot_dimension_numbers<[1], [0], [0], [1], [0, 0, 1, 1], [], []>} : vector<16x16xf32>, vector<16x16xf32>, vector<16x16xf32> -> vector<16x16xf32>
    %cst_117 = arith.constant 2.500000e-01 : f32
    %260 = vector.broadcast %cst_117 : f32 to vector<16x16xf32>
    %261 = arith.mulf %259, %260 : vector<16x16xf32>
    %262 = arith.addf %261, %1 : vector<16x16xf32>
    %cst_118 = arith.constant dense<0xFF800000> : vector<16xf32>
    %263 = vector.multi_reduction <maximumf>, %262, %cst_118 [1] : vector<16x16xf32> to vector<16xf32>
    %264 = vector.shape_cast %263 : vector<16xf32> to vector<16x1xf32>
    %265 = vector.broadcast %264 : vector<16x1xf32> to vector<16x16xf32>
    %266 = arith.subf %262, %265 : vector<16x16xf32>
    %267 = math.exp %266 : vector<16x16xf32>
    %cst_119 = arith.constant dense<0.000000e+00> : vector<16xf32>
    %268 = vector.multi_reduction <add>, %267, %cst_119 [1] : vector<16x16xf32> to vector<16xf32>
    %269 = vector.shape_cast %268 : vector<16xf32> to vector<16x1xf32>
    %270 = tpu.reciprocal %269 {approx = true} : vector<16x1xf32> -> vector<16x1xf32>
    %271 = vector.broadcast %270 : vector<16x1xf32> to vector<16x16xf32>
    %272 = arith.mulf %267, %271 : vector<16x16xf32>
    %273 = vector.extract_strided_slice %231 {offsets = [0, 16], sizes = [16, 16], strides = [1, 1]} : vector<16x64xf32> to vector<16x16xf32>
    %cst_120 = arith.constant dense<0.000000e+00> : vector<16x16xf32>
    %274 = tpu.matmul %272, %273, %cst_120 {dimension_numbers = #tpu.dot_dimension_numbers<[1], [0], [0], [1], [0, 0, 1, 1], [], []>} : vector<16x16xf32>, vector<16x16xf32>, vector<16x16xf32> -> vector<16x16xf32>
    %c0_121 = arith.constant 0 : index
    %c16_122 = arith.constant 16 : index
    %275 = vector.load %arg15[%c0_121, %c16_122] : memref<16x64xf32, #tpu.memory_space<vmem>>, vector<16x16xf32>
    tpu.vector_store %arg15[%c0_121, %c16_122], %274 {strides = array<i32>} : memref<16x64xf32, #tpu.memory_space<vmem>>, vector<16x16xf32>,
    %276 = vector.extract_strided_slice %233 {offsets = [0, 32], sizes = [16, 16], strides = [1, 1]} : vector<16x64xf32> to vector<16x16xf32>
    %277 = vector.extract_strided_slice %235 {offsets = [0, 32], sizes = [16, 16], strides = [1, 1]} : vector<16x64xf32> to vector<16x16xf32>
    %278 = tpu.transpose %277, [1, 0] : vector<16x16xf32> -> vector<16x16xf32>
    %cst_123 = arith.constant dense<0.000000e+00> : vector<16x16xf32>
    %279 = tpu.matmul %276, %278, %cst_123 {dimension_numbers = #tpu.dot_dimension_numbers<[1], [0], [0], [1], [0, 0, 1, 1], [], []>} : vector<16x16xf32>, vector<16x16xf32>, vector<16x16xf32> -> vector<16x16xf32>
    %cst_124 = arith.constant 2.500000e-01 : f32
    %280 = vector.broadcast %cst_124 : f32 to vector<16x16xf32>
    %281 = arith.mulf %279, %280 : vector<16x16xf32>
    %282 = arith.addf %281, %1 : vector<16x16xf32>
    %cst_125 = arith.constant dense<0xFF800000> : vector<16xf32>
    %283 = vector.multi_reduction <maximumf>, %282, %cst_125 [1] : vector<16x16xf32> to vector<16xf32>
    %284 = vector.shape_cast %283 : vector<16xf32> to vector<16x1xf32>
    %285 = vector.broadcast %284 : vector<16x1xf32> to vector<16x16xf32>
    %286 = arith.subf %282, %285 : vector<16x16xf32>
    %287 = math.exp %286 : vector<16x16xf32>
    %cst_126 = arith.constant dense<0.000000e+00> : vector<16xf32>
    %288 = vector.multi_reduction <add>, %287, %cst_126 [1] : vector<16x16xf32> to vector<16xf32>
    %289 = vector.shape_cast %288 : vector<16xf32> to vector<16x1xf32>
    %290 = tpu.reciprocal %289 {approx = true} : vector<16x1xf32> -> vector<16x1xf32>
    %291 = vector.broadcast %290 : vector<16x1xf32> to vector<16x16xf32>
    %292 = arith.mulf %287, %291 : vector<16x16xf32>
    %293 = vector.extract_strided_slice %231 {offsets = [0, 32], sizes = [16, 16], strides = [1, 1]} : vector<16x64xf32> to vector<16x16xf32>
    %cst_127 = arith.constant dense<0.000000e+00> : vector<16x16xf32>
    %294 = tpu.matmul %292, %293, %cst_127 {dimension_numbers = #tpu.dot_dimension_numbers<[1], [0], [0], [1], [0, 0, 1, 1], [], []>} : vector<16x16xf32>, vector<16x16xf32>, vector<16x16xf32> -> vector<16x16xf32>
    %c0_128 = arith.constant 0 : index
    %c32_129 = arith.constant 32 : index
    %295 = vector.load %arg15[%c0_128, %c32_129] : memref<16x64xf32, #tpu.memory_space<vmem>>, vector<16x16xf32>
    tpu.vector_store %arg15[%c0_128, %c32_129], %294 {strides = array<i32>} : memref<16x64xf32, #tpu.memory_space<vmem>>, vector<16x16xf32>,
    %296 = vector.extract_strided_slice %233 {offsets = [0, 48], sizes = [16, 16], strides = [1, 1]} : vector<16x64xf32> to vector<16x16xf32>
    %297 = vector.extract_strided_slice %235 {offsets = [0, 48], sizes = [16, 16], strides = [1, 1]} : vector<16x64xf32> to vector<16x16xf32>
    %298 = tpu.transpose %297, [1, 0] : vector<16x16xf32> -> vector<16x16xf32>
    %cst_130 = arith.constant dense<0.000000e+00> : vector<16x16xf32>
    %299 = tpu.matmul %296, %298, %cst_130 {dimension_numbers = #tpu.dot_dimension_numbers<[1], [0], [0], [1], [0, 0, 1, 1], [], []>} : vector<16x16xf32>, vector<16x16xf32>, vector<16x16xf32> -> vector<16x16xf32>
    %cst_131 = arith.constant 2.500000e-01 : f32
    %300 = vector.broadcast %cst_131 : f32 to vector<16x16xf32>
    %301 = arith.mulf %299, %300 : vector<16x16xf32>
    %302 = arith.addf %301, %1 : vector<16x16xf32>
    %cst_132 = arith.constant dense<0xFF800000> : vector<16xf32>
    %303 = vector.multi_reduction <maximumf>, %302, %cst_132 [1] : vector<16x16xf32> to vector<16xf32>
    %304 = vector.shape_cast %303 : vector<16xf32> to vector<16x1xf32>
    %305 = vector.broadcast %304 : vector<16x1xf32> to vector<16x16xf32>
    %306 = arith.subf %302, %305 : vector<16x16xf32>
    %307 = math.exp %306 : vector<16x16xf32>
    %cst_133 = arith.constant dense<0.000000e+00> : vector<16xf32>
    %308 = vector.multi_reduction <add>, %307, %cst_133 [1] : vector<16x16xf32> to vector<16xf32>
    %309 = vector.shape_cast %308 : vector<16xf32> to vector<16x1xf32>
    %310 = tpu.reciprocal %309 {approx = true} : vector<16x1xf32> -> vector<16x1xf32>
    %311 = vector.broadcast %310 : vector<16x1xf32> to vector<16x16xf32>
    %312 = arith.mulf %307, %311 : vector<16x16xf32>
    %313 = vector.extract_strided_slice %231 {offsets = [0, 48], sizes = [16, 16], strides = [1, 1]} : vector<16x64xf32> to vector<16x16xf32>
    %cst_134 = arith.constant dense<0.000000e+00> : vector<16x16xf32>
    %314 = tpu.matmul %312, %313, %cst_134 {dimension_numbers = #tpu.dot_dimension_numbers<[1], [0], [0], [1], [0, 0, 1, 1], [], []>} : vector<16x16xf32>, vector<16x16xf32>, vector<16x16xf32> -> vector<16x16xf32>
    %c0_135 = arith.constant 0 : index
    %c48_136 = arith.constant 48 : index
    %315 = vector.load %arg15[%c0_135, %c48_136] : memref<16x64xf32, #tpu.memory_space<vmem>>, vector<16x16xf32>
    tpu.vector_store %arg15[%c0_135, %c48_136], %314 {strides = array<i32>} : memref<16x64xf32, #tpu.memory_space<vmem>>, vector<16x16xf32>,
    %c0_137 = arith.constant 0 : index
    %c0_138 = arith.constant 0 : index
    %316 = vector.load %arg15[%c0_137, %c0_138] : memref<16x64xf32, #tpu.memory_space<vmem>>, vector<16x64xf32>
    %317 = arith.negf %183 : vector<16x64xf32>
    %318 = math.exp %317 : vector<16x64xf32>
    %cst_139 = arith.constant 1.000000e+00 : f32
    %319 = vector.broadcast %cst_139 : f32 to vector<16x64xf32>
    %320 = arith.addf %319, %318 : vector<16x64xf32>
    %321 = arith.divf %319, %320 : vector<16x64xf32>
    %322 = arith.mulf %183, %321 : vector<16x64xf32>
    %323 = arith.mulf %316, %322 : vector<16x64xf32>
    %c0_140 = arith.constant 0 : index
    %c0_141 = arith.constant 0 : index
    %324 = vector.load %arg11[%c0_140, %c0_141] : memref<64x32xf32, #tpu.memory_space<vmem>>, vector<64x32xf32>
    %cst_142 = arith.constant dense<0.000000e+00> : vector<16x32xf32>
    %325 = tpu.matmul %323, %324, %cst_142 {dimension_numbers = #tpu.dot_dimension_numbers<[1], [0], [0], [1], [0, 0, 1, 1], [], []>} : vector<16x64xf32>, vector<64x32xf32>, vector<16x32xf32> -> vector<16x32xf32>
    %326 = vector.broadcast %0 : vector<16x1xf32> to vector<16x32xf32>
    %327 = arith.mulf %325, %326 : vector<16x32xf32>
    %328 = arith.addf %327, %178 : vector<16x32xf32>
    %cst_143 = arith.constant dense<0.000000e+00> : vector<16xf32>
    %329 = vector.multi_reduction <add>, %328, %cst_143 [1] : vector<16x32xf32> to vector<16xf32>
    %330 = vector.shape_cast %329 : vector<16xf32> to vector<16x1xf32>
    %cst_144 = arith.constant 3.200000e+01 : f32
    %331 = vector.broadcast %cst_144 : f32 to vector<16x1xf32>
    %332 = arith.divf %330, %331 : vector<16x1xf32>
    %333 = vector.broadcast %332 : vector<16x1xf32> to vector<16x32xf32>
    %334 = arith.subf %328, %333 : vector<16x32xf32>
    %335 = arith.mulf %334, %334 : vector<16x32xf32>
    %cst_145 = arith.constant dense<0.000000e+00> : vector<16xf32>
    %336 = vector.multi_reduction <add>, %335, %cst_145 [1] : vector<16x32xf32> to vector<16xf32>
    %337 = vector.shape_cast %336 : vector<16xf32> to vector<16x1xf32>
    %cst_146 = arith.constant 3.200000e+01 : f32
    %338 = vector.broadcast %cst_146 : f32 to vector<16x1xf32>
    %339 = arith.divf %337, %338 : vector<16x1xf32>
    %340 = vector.broadcast %332 : vector<16x1xf32> to vector<16x32xf32>
    %341 = arith.subf %328, %340 : vector<16x32xf32>
    %cst_147 = arith.constant 9.99999974E-6 : f32
    %342 = vector.broadcast %cst_147 : f32 to vector<16x1xf32>
    %343 = arith.addf %339, %342 : vector<16x1xf32>
    %344 = math.rsqrt %343 : vector<16x1xf32>
    %345 = vector.broadcast %344 : vector<16x1xf32> to vector<16x32xf32>
    %346 = arith.mulf %341, %345 : vector<16x32xf32>
    %347 = vector.broadcast %3 : vector<1x32xf32> to vector<16x32xf32>
    %348 = arith.mulf %346, %347 : vector<16x32xf32>
    %349 = vector.broadcast %4 : vector<1x32xf32> to vector<16x32xf32>
    %350 = arith.addf %348, %349 : vector<16x32xf32>
    %351 = vector.broadcast %0 : vector<16x1xf32> to vector<16x32xf32>
    %352 = arith.mulf %350, %351 : vector<16x32xf32>
    %c1_148 = arith.constant 1 : index
    %c0_149 = arith.constant 0 : index
    %c0_150 = arith.constant 0 : index
    %353 = vector.load %arg14[%c1_148, %c0_149, %c0_150] : memref<2x16x32xf32, #tpu.memory_space<vmem>>, vector<1x16x32xf32>
    %354 = vector.shape_cast %353 : vector<1x16x32xf32> to vector<16x32xf32>
    %355 = vector.shape_cast %352 : vector<16x32xf32> to vector<1x16x32xf32>
    tpu.vector_store %arg14[%c1_148, %c0_149, %c0_150], %355 {strides = array<i32>} : memref<2x16x32xf32, #tpu.memory_space<vmem>>, vector<1x16x32xf32>,
    return
  }
  func.func @transform_0(%arg0: i32) -> (i32, i32) {
    %c0_i32 = arith.constant 0 : i32
    %c0_i32_0 = arith.constant 0 : i32
    return %arg0, %c0_i32 : i32, i32
  }
  func.func @transform_1(%arg0: i32) -> (i32, i32) {
    %c0_i32 = arith.constant 0 : i32
    %c0_i32_0 = arith.constant 0 : i32
    return %arg0, %c0_i32 : i32, i32
  }
  func.func @transform_2(%arg0: i32) -> (i32, i32, i32) {
    %c0_i32 = arith.constant 0 : i32
    %c0_i32_0 = arith.constant 0 : i32
    %c0_i32_1 = arith.constant 0 : i32
    %c0_i32_2 = arith.constant 0 : i32
    return %c0_i32, %c0_i32_0, %c0_i32_1 : i32, i32, i32
  }
  func.func @transform_3(%arg0: i32) -> (i32, i32) {
    %c0_i32 = arith.constant 0 : i32
    %c0_i32_0 = arith.constant 0 : i32
    %c0_i32_1 = arith.constant 0 : i32
    return %c0_i32, %c0_i32_0 : i32, i32
  }
  func.func @transform_4(%arg0: i32) -> (i32, i32) {
    %c0_i32 = arith.constant 0 : i32
    %c0_i32_0 = arith.constant 0 : i32
    %c0_i32_1 = arith.constant 0 : i32
    return %c0_i32, %c0_i32_0 : i32, i32
  }
  func.func @transform_5(%arg0: i32) -> (i32, i32) {
    %c0_i32 = arith.constant 0 : i32
    %c0_i32_0 = arith.constant 0 : i32
    %c0_i32_1 = arith.constant 0 : i32
    return %c0_i32, %c0_i32_0 : i32, i32
  }
  func.func @transform_6(%arg0: i32) -> (i32, i32) {
    %c0_i32 = arith.constant 0 : i32
    %c0_i32_0 = arith.constant 0 : i32
    %c0_i32_1 = arith.constant 0 : i32
    return %c0_i32, %c0_i32_0 : i32, i32
  }
  func.func @transform_7(%arg0: i32) -> (i32, i32) {
    %c0_i32 = arith.constant 0 : i32
    %c0_i32_0 = arith.constant 0 : i32
    %c0_i32_1 = arith.constant 0 : i32
    return %c0_i32, %c0_i32_0 : i32, i32
  }
  func.func @transform_8(%arg0: i32) -> (i32, i32) {
    %c0_i32 = arith.constant 0 : i32
    %c0_i32_0 = arith.constant 0 : i32
    %c0_i32_1 = arith.constant 0 : i32
    return %c0_i32, %c0_i32_0 : i32, i32
  }
  func.func @transform_9(%arg0: i32) -> (i32, i32) {
    %c0_i32 = arith.constant 0 : i32
    %c0_i32_0 = arith.constant 0 : i32
    %c0_i32_1 = arith.constant 0 : i32
    return %c0_i32, %c0_i32_0 : i32, i32
  }
  func.func @transform_10(%arg0: i32) -> (i32, i32) {
    %c0_i32 = arith.constant 0 : i32
    %c0_i32_0 = arith.constant 0 : i32
    %c0_i32_1 = arith.constant 0 : i32
    return %c0_i32, %c0_i32_0 : i32, i32
  }
  func.func @transform_11(%arg0: i32) -> (i32, i32) {
    %c0_i32 = arith.constant 0 : i32
    %c0_i32_0 = arith.constant 0 : i32
    %c0_i32_1 = arith.constant 0 : i32
    return %c0_i32, %c0_i32_0 : i32, i32
  }
  func.func @transform_12(%arg0: i32) -> (i32, i32) {
    %c0_i32 = arith.constant 0 : i32
    %c0_i32_0 = arith.constant 0 : i32
    %c0_i32_1 = arith.constant 0 : i32
    return %c0_i32, %c0_i32_0 : i32, i32
  }
  func.func @transform_13(%arg0: i32) -> (i32, i32, i32) {
    %c0_i32 = arith.constant 0 : i32
    %c0_i32_0 = arith.constant 0 : i32
    %c0_i32_1 = arith.constant 0 : i32
    return %c0_i32, %arg0, %c0_i32_0 : i32, i32, i32
  }
}

</mosaic_0001>

<bundles_post_ra>
// kernel: bert_encoder_forward.1
= control target key start
LH: loop header
LB: loop body
LE: loop exit
PB: predicated region body
PF: predicated region fallthrough
CT: control target
= control target key end

     0   :  { %v3846_v0 = vmov 0   ;;  %vm69_vm0 = vcmask 261120   ;;  %v247_v54 = vlaneseq  ;;  %vm355_vm4 = vcmask 523264   ;;  %s3848_s23 = smov 96   ;;  %s3852_s19 = smov 48   ;;  %s4595_s1 = inlined_call_operand.vmem [shape: f32[16,1], index: 1, kind: input, shape index: {}]   ;;  %s4596_s4 = inlined_call_operand.vmem [shape: f32[32,64], index: 4, kind: input, shape index: {}]   ;;  %s4597_s5 = inlined_call_operand.vmem [shape: f32[32,64], index: 5, kind: input, shape index: {}]   ;;  %s4598_s2 = inlined_call_operand.vmem [shape: f32[3,16,1], index: 2, kind: input, shape index: {}]   ;;  %s4599_s0 = inlined_call_operand.vmem [shape: f32[16,32], index: 0, kind: input, shape index: {}]   ;;  %s4600_s8 = inlined_call_operand.vmem [shape: f32[64,64], index: 8, kind: input, shape index: {}]   ;;  %s4601_s9 = inlined_call_operand.vmem [shape: f32[64,64], index: 9, kind: input, shape index: {}]   ;;  %s4602_s6 = inlined_call_operand.vmem [shape: f32[4,64], index: 6, kind: input, shape index: {}]   ;;  %s4603_s7 = inlined_call_operand.vmem [shape: f32[1,64], index: 7, kind: input, shape index: {}]   ;;  %s4604_s3 = inlined_call_operand.vmem [shape: f32[16,16], index: 3, kind: input, shape index: {}]   ;;  %s4605_s10 = inlined_call_operand.vmem [shape: f32[64,32], index: 10, kind: input, shape index: {}]   ;;  %s4606_s11 = inlined_call_operand.vmem [shape: f32[1,32], index: 11, kind: input, shape index: {}]   ;;  %s4607_s12 = inlined_call_operand.vmem [shape: f32[1,32], index: 12, kind: input, shape index: {}]   ;;  %s4608_s13 = inlined_call_operand.vmem [shape: f32[2,16,32], index: 13, kind: output, shape index: {}]  }
   0x1   :  { %3678 = vset.pattern.permute.xlu0 %v3846_v0  ;;  %v44_v1 = vld [vmem:[%s4595_s1] sm:$0xff]  ;;  %3679 = vset.pattern.permute.xlu1 %v3846_v0  ;;  %v66_v3 = vld [vmem:[%s4596_s4 + $0x8] sm:$0xff]  ;;  %v67_v6 = vld [vmem:[%s4596_s4 + $0x10] sm:$0xff]  ;;  %vm520_vm5 = vcmask 130048   ;;  %vm929_vm7 = vcmask 261248   ;;  %vm1144_vm8 = vcmask 392448  }
   0x2   :  { %55 = vperm.xlu0 %3678, %v44_v1   ;;  %v65_v2 = vld [vmem:[%s4596_s4] sm:$0xff]  ;;  %v45_v4 = vld [vmem:[%s4595_s1 + $0x8] sm:$0xff]  ;;  %v68_v7 = vld [vmem:[%s4596_s4 + $0x18] sm:$0xff]  ;;  %v4113_v56 = vshrl.u32 %v247_v54, 7  ;;  %s3851_s1 = smov 32   ;;  %vm1359_vm9 = vcmask 523648  }
   0x3   :  { %v3935_v5 = vpack.c.bf16 %v66_v3, %v65_v2  ;;  %v3943_v8 = vpack.c.bf16 %v68_v7, %v67_v6  ;;  %v151_v9 = vld [vmem:[%s4597_s5] sm:$0xff]  ;;  %v152_v10 = vld [vmem:[%s4597_s5 + $0x8] sm:$0xff]  ;;  %v3956_v11 = vld [vmem:[%s4598_s2 + $0x10] sm:$0xff] }
   0x4   :  { %v3959_v12 = vpack.c.bf16 %v152_v10, %v151_v9  ;;  %v3966_v13 = vld [vmem:[%s4598_s2 + $0x20] sm:$0xff]  ;;  %v3979_v15 = vld [vmem:[%s4598_s2 + $0x8] sm:$0xff]  ;;  %v3985_v16 = vld [vmem:[%s4598_s2 + $0x18] sm:$0xff]  ;;  %vm249_vm1 = vcmp.lt.s32.totalorder %v4113_v56, 3  ;;  %vm277_vm2 = vcmp.lt.s32.totalorder %v4113_v56, 2  ;;  %vm306_vm3 = vcmp.lt.s32.totalorder %v4113_v56, 1 }
   0x5   :  { %3464 = vmatprep.subr.bf16.mxu1 %v3935_v5  ;;  %v3973_v14 = vld [vmem:[%s4598_s2] sm:$0xff]  ;;  %v3991_v17 = vld [vmem:[%s4598_s2 + $0x28] sm:$0xff]  ;;  %v153_v22 = vld [vmem:[%s4597_s5 + $0x10] sm:$0xff]  ;;  %s3847_s2 = smov 112  }
   0x6   :  { %60 = vperm.xlu0 %3678, %v45_v4   ;;  %3466 = vmatpush3.bf16.msra.mxu1 %v3935_v5  ;;  %v51_v18 = vld [vmem:[%s4599_s0] sm:$0xff]  ;;  %v52_v21 = vld [vmem:[%s4599_s0 + $0x8] sm:$0xff]  ;;  %v154_v23 = vld [vmem:[%s4597_s5 + $0x18] sm:$0xff]  ;;  %s3849_s0 = smov 80   ;;  %s3850_s5 = smov 16  }
   0x7   :  { %3468 = vmatprep.subr.bf16.mxu1 %v3943_v8  ;;  %256 = vperm.xlu1 %3679, %v3973_v14   ;;  %v4018_v26 = vpack.c.bf16 %v154_v23, %v153_v22  ;;  %v347_v27 = vld [vmem:[%s4600_s8] sm:$0xff]  ;;  %v348_v28 = vld [vmem:[%s4600_s8 + $0x8] sm:$0xff]  ;;  %v349_v33 = vld [vmem:[%s4600_s8 + $0x10] sm:$0xff] }
   0x8   :  { %v437_v29 = vld [vmem:[%s4601_s9] sm:$0xff]  ;;  %v4038_v30 = vpack.c.bf16 %v348_v28, %v347_v27  ;;  %v438_v31 = vld [vmem:[%s4601_s9 + $0x8] sm:$0xff]  ;;  %v350_v34 = vld [vmem:[%s4600_s8 + $0x18] sm:$0xff] }
   0x9   :  { %v4043_v32 = vpack.c.bf16 %v438_v31, %v437_v29  ;;  %v439_v35 = vld [vmem:[%s4601_s9 + $0x10] sm:$0xff]  ;;  %v4058_v36 = vpack.c.bf16 %v350_v34, %v349_v33  ;;  %v440_v37 = vld [vmem:[%s4601_s9 + $0x18] sm:$0xff]  ;;  %v351_v39 = vld [vmem:[%s4600_s8 + $0x20] sm:$0xff] }
   0xa   :  { %285 = vperm.xlu0 %3678, %v3956_v11   ;;  %3470 = vmatpush3.bf16.msra.mxu1 %v3943_v8  ;;  %v4063_v38 = vpack.c.bf16 %v440_v37, %v439_v35  ;;  %v352_v40 = vld [vmem:[%s4600_s8 + $0x28] sm:$0xff]  ;;  %v441_v41 = vld [vmem:[%s4601_s9 + $0x20] sm:$0xff]  ;;  %v353_v45 = vld [vmem:[%s4600_s8 + $0x30] sm:$0xff] }
   0xb   :  { %3472 = vmatprep.subr.bf16.mxu1 %v3959_v12  ;;  %261 = vperm.xlu1 %3679, %v3979_v15   ;;  %v4078_v42 = vpack.c.bf16 %v352_v40, %v351_v39  ;;  %v442_v43 = vld [vmem:[%s4601_s9 + $0x28] sm:$0xff]  ;;  %v354_v46 = vld [vmem:[%s4600_s8 + $0x38] sm:$0xff]  ;;  %v443_v47 = vld [vmem:[%s4601_s9 + $0x30] sm:$0xff] }
   0xc   :  { %3480 = vmatprep.subr.bf16.mxu0 %v4038_v30  ;;  %v4083_v44 = vpack.c.bf16 %v442_v43, %v441_v41  ;;  %v4098_v48 = vpack.c.bf16 %v354_v46, %v353_v45  ;;  %v444_v49 = vld [vmem:[%s4601_s9 + $0x38] sm:$0xff]  ;;  %v4118_v59 = vld [vmem:[%s4602_s6 + $0x3] ss:$0 sm:$0xff]  ;;  %v4128_v7 = vld [vmem:[%s4603_s7] ss:$0 sm:$0xff] }
   0xd   :  { %3482 = vmatpush3.bf16.msra.mxu0 %v4038_v30  ;;  %v4103_v50 = vpack.c.bf16 %v444_v49, %v443_v47  ;;  %v4146_v31 = vld [vmem:[%s4602_s6 + $0x1] ss:$0 sm:$0xff]  ;;  %v4159_v47 = vld [vmem:[%s4602_s6 + $0x2] ss:$0 sm:$0xff]  ;;  %vm4177_vm6 = vmpackc.low %vm520_vm5, %vm520_vm5 }
   0xe   :  { %314 = vperm.xlu0 %3678, %v3966_v13   ;;  %3484 = vmatprep.subr.bf16.mxu0 %v4058_v36 }
   0xf   :  { %290 = vperm.xlu1 %3679, %v3985_v16  }
  0x11   :  { %3486 = vmatpush3.bf16.msra.mxu0 %v4058_v36 }
  0x12   :  { %3488 = vmatprep.subr.bf16.mxu0 %v4078_v42 }
  0x13   :  { %319 = vperm.xlu1 %3679, %v3991_v17  }
  0x15   :  { %3490 = vmatpush3.bf16.msra.mxu0 %v4078_v42 }
  0x16   :  { %3492 = vmatprep.subr.bf16.mxu0 %v4098_v48 }
  0x19   :  { %3494 = vmatpush3.bf16.msra.mxu0 %v4098_v48 }
  0x81   :  { %v3997_v19 = vpop.permute.xlu0 %55 }
  0x82   :  { %v4000_v20 = vmul.f32 %v3997_v19, %v51_v18  ;;  %v4137_v18 = vld [vmem:[%s4602_s6] ss:$0 sm:$0xff] }
  0x84   :  { %3201 = vmatprep.mubr.msk.f32.mxu1 %vm69_vm0, %v4000_v20 }
  0x85   :  { %v4013_v24 = vpop.permute.xlu0 %60 }
  0x86   :  { %v4016_v25 = vmul.f32 %v4013_v24, %v52_v21  ;;  %v257_v51 = vpop.permute.xlu1 %256 }
  0x88   :  { %3202 = vmatmul.mubr.msk.f32.vlgmr.msra.gmra.mrb[0].mxu1 %vm69_vm0, %v4016_v25 }
  0x89   :  { %3474 = vmatpush3.bf16.msra.mxu1 %v3959_v12  ;;  %3212 = vmatprep.mubr.msk.f32.mxu1 %vm69_vm0, %v4000_v20  ;;  %v286_v57 = vpop.permute.xlu0 %285 }
  0x8a   :  { %3476 = vmatprep.subr.bf16.mxu1 %v4018_v26  ;;  %v262_v55 = vpop.permute.xlu1 %261 }
  0x8d   :  { %3478 = vmatpush3.bf16.msra.mxu1 %v4018_v26  ;;  %v315_v35 = vpop.permute.xlu0 %314 }
  0x8e   :  { %3496 = vmatprep.subr.bf16.mxu1 %v4043_v32  ;;  %v291_v60 = vpop.permute.xlu1 %290 }
  0x90   :  { %3213 = vmatmul.mubr.msk.f32.vlgmr.msra.gmra.mrb[2].mxu1 %vm69_vm0, %v4016_v25 }
  0x91   :  { %3498 = vmatpush3.bf16.msra.mxu1 %v4043_v32 }
  0x92   :  { %3500 = vmatprep.subr.bf16.mxu1 %v4063_v38  ;;  %v320_v37 = vpop.permute.xlu1 %319 }
  0x95   :  { %3502 = vmatpush3.bf16.msra.mxu1 %v4063_v38 }
  0x96   :  { %3504 = vmatprep.subr.bf16.mxu1 %v4083_v44 }
  0x99   :  { %3506 = vmatpush3.bf16.msra.mxu1 %v4083_v44 }
  0x9a   :  { %3508 = vmatprep.subr.bf16.mxu1 %v4103_v50 }
  0x9d   :  { %3510 = vmatpush3.bf16.msra.mxu1 %v4103_v50 }
 0x15b   :  { %v4109_v52 = vpop.f32.mrb[0].mxu1 }
 0x15c   :  { %v4111_v53 = vpop.f32.mrb[1].mxu1 }
 0x163   :  { %v3214_v58 = vpop.f32.mrb[2].mxu1 }
 0x164   :  { %v246_v61 = vrot.slane %v3214_v58, 5  ;;  %v276_v62 = vrot.slane %v3214_v58, 6  ;;  %v221_v63 = vpop.f32.mrb[3].mxu1  ;;  %v305_v0 = vrot.slane %v3214_v58, 7  ;;  %v236_v4 = vmul.f32 %v3214_v58, %v4118_v59 }
 0x165   :  { %v245_v1 = vrot.slane %v221_v63, 5  ;;  %v275_v2 = vrot.slane %v221_v63, 6  ;;  %v304_v3 = vrot.slane %v221_v63, 7  ;;  %v235_v6 = vmul.f32 %v4118_v59, %v221_v63 }
 0x166   :  { %v244_v39 = vadd.f32 %v4128_v7, %v236_v4 }
 0x167   :  { %v250_v9 = vsel %vm249_vm1, %v245_v1, %v246_v61  ;;  %v251_v10 = vsel %vm249_vm1, %v246_v61, %v245_v1  ;;  %v278_v21 = vsel %vm277_vm2, %v275_v2, %v276_v62  ;;  %v279_v27 = vsel %vm277_vm2, %v276_v62, %v275_v2 }
 0x168   :  { %v264_v22 = vmul.f32 %v257_v51, %v251_v10  ;;  %v265_v23 = vmul.f32 %v262_v55, %v250_v9  ;;  %v294_v28 = vmul.f32 %v291_v60, %v278_v21  ;;  %v293_v29 = vmul.f32 %v286_v57, %v279_v27 }
 0x169   :  { %v307_v33 = vsel %vm306_vm3, %v304_v3, %v305_v0  ;;  %v308_v34 = vsel %vm306_vm3, %v305_v0, %v304_v3  ;;  %v243_v40 = vadd.f32 %v4128_v7, %v235_v6 }
 0x16a   :  { %v271_v41 = vmul.f32 %v4137_v18, %v264_v22  ;;  %v272_v43 = vmul.f32 %v4137_v18, %v265_v23  ;;  %v322_v45 = vmul.f32 %v315_v35, %v308_v34  ;;  %v323_v46 = vmul.f32 %v320_v37, %v307_v33 }
 0x16b   :  { %v300_v54 = vmul.f32 %v4146_v31, %v293_v29  ;;  %v301_v55 = vmul.f32 %v4146_v31, %v294_v28 }
 0x16c   :  { %v273_v49 = vadd.f32 %v271_v41, %v243_v40  ;;  %v274_v51 = vadd.f32 %v272_v43, %v244_v39  ;;  %v329_v60 = vmul.f32 %v4159_v47, %v322_v45  ;;  %v330_v61 = vmul.f32 %v4159_v47, %v323_v46  ;;  %v4194_v41 = vld [vmem:[%s4604_s3 + $0x8] sm:$0xff]  ;;  %v4199_v46 = vld [vmem:[%s4604_s3] sm:$0xff] }
 0x16e   :  { %v302_v57 = vadd.f32 %v300_v54, %v273_v49  ;;  %v303_v58 = vadd.f32 %v301_v55, %v274_v51 }
 0x170   :  { %v331_v62 = vadd.f32 %v329_v60, %v302_v57  ;;  %v332_v63 = vadd.f32 %v330_v61, %v303_v58 }
 0x172   :  { %v2961_v0 = vmul.f32 -1.442695, %v331_v62  ;;  %v2962_v1 = vmul.f32 -1.442695, %v332_v63 }
 0x174   :  { %3740 = vpow2.f32 %v2961_v0 }
 0x175   :  { %3742 = vpow2.f32 %v2962_v1 }
 0x17e   :  { %v3741_v2 = vpop.eup %3740 }
 0x17f   :  { %v3743_v3 = vpop.eup %3742  ;;  %v339_v4 = vadd.f32 1.0, %v3741_v2 }
 0x180   :  { %v340_v6 = vadd.f32 1.0, %v3743_v3 }
 0x181   :  { %3744 = vrcp.f32 %v339_v4 }
 0x182   :  { %3746 = vrcp.f32 %v340_v6 }
 0x18b   :  { %v3745_v9 = vpop.eup %3744 }
 0x18c   :  { %v3747_v10 = vpop.eup %3746  ;;  %v345_v21 = vmul.f32 %v3745_v9, %v331_v62 }
 0x18d   :  { %v346_v22 = vmul.f32 %v3747_v10, %v332_v63 }
 0x18e   :  { %3231 = vmatprep.mubr.msk.f32.mxu0 %vm355_vm4, %v345_v21  ;;  %3250 = vmatprep.mubr.msk.f32.mxu1 %vm355_vm4, %v345_v21 }
 0x18f   :  { %3232 = vmatmul.mubr.msk.f32.vlgmr.msra.gmra.mrb[0].mxu0 %vm355_vm4, %v346_v22  ;;  %3251 = vmatmul.mubr.msk.f32.vlgmr.msra.gmra.mrb[4].mxu1 %vm355_vm4, %v346_v22  ;;  %v3517_v23 = vpack.c.bf16 %v346_v22, %v345_v21  ;;  %v4169_v27 = vpack.i.bf16 %v346_v22, %v345_v21 }
 0x191   :  { %3518 = vmatprep.subr.bf16.mxu1 %v3517_v23 }
 0x192   :  { %3520 = vmatpush3.bf16.msra.mxu1 %v3517_v23 }
 0x262   :  { %v4171_v28 = vpop.f32.mrb[0].mxu0  ;;  %v3252_v29 = vpop.f32.mrb[4].mxu1 }
 0x263   :  { %v4173_v33 = vpop.f32.mrb[1].mxu0  ;;  %v511_v34 = vpop.f32.mrb[5].mxu1 }
 0x264   :  { %v3511_v37 = vpack.c.bf16 %v3252_v29, %v511_v34  ;;  %3257 = vmatprep.mubr.msk.f32.mxu0 %vm520_vm5, %v4173_v33  ;;  %v4183_v39 = vpack.i.bf16 %v3252_v29, %v511_v34 }
 0x266   :  { %3513 = vmatprep.subr.msk.bf16.mxu0 %vm4177_vm6, %v3511_v37 }
 0x267   :  { %3516 = vmatpush3.bf16.xpose.msk.msra.mxu0 %vm4177_vm6, %v3511_v37 }
 0x26e   :  { %3258 = vmatmul.mubr.msk.f32.vlgmr.msra.gmra.mrb[2].mxu0 %vm520_vm5, %v4171_v28 }
 0x341   :  { %v3259_v40 = vpop.f32.mrb[2].mxu0 }
 0x342   :  { %v609_v43 = vmul.f32 0.25, %v3259_v40  ;;  %v599_v45 = vpop.f32.mrb[3].mxu0 }
 0x343   :  { %v608_v49 = vmul.f32 0.25, %v599_v45 }
 0x344   :  { %v611_v51 = vadd.f32 %v609_v43, %v4194_v41 }
 0x345   :  { %v610_v54 = vadd.f32 %v608_v49, %v4199_v46 }
 0x346   :  { %v615_v55 = vsel %vm520_vm5, %v611_v51, -inf }
 0x347   :  { %616 = vmax.xlane.f32.xlu1 %v615_v55  ;;  %v612_v57 = vsel %vm520_vm5, %v610_v54, -inf }
 0x348   :  { %613 = vmax.xlane.f32.xlu0 %v612_v57 }
 0x358   :  { %3681 = vrot.lane.b32.xlu1 %v4183_v39, %s3847_s2 }
 0x35c   :  { %719 = vrot.lane.b32.xlu1 %v4171_v28, %s3847_s2 }
 0x3d4   :  { %v617_v58 = vpop.xlane.xlu1 %616 }
 0x3d5   :  { %v619_v60 = vsub.f32 %v611_v51, %v617_v58  ;;  %v614_v61 = vpop.xlane.xlu0 %613 }
 0x3d6   :  { %v618_v62 = vsub.f32 %v610_v54, %v614_v61 }
 0x3d7   :  { %v622_v63 = vmul.f32 1.442695, %v619_v60 }
 0x3d8   :  { %v620_v0 = vmul.f32 1.442695, %v618_v62  ;;  %v3682_v1 = vpop.permute.xlu1 %3681 }
 0x3d9   :  { %v3684_v2 = vunpack.i.h.bf16 %v3682_v1  ;;  %v3683_v3 = vunpack.i.l.bf16 %v3682_v1 }
 0x3da   :  { %3748 = vpow2.f32 %v620_v0 }
 0x3db   :  { %v3521_v4 = vpack.c.bf16 %v3684_v2, %v3683_v3  ;;  %3750 = vpow2.f32 %v622_v63 }
 0x3dc   :  { %v720_v45 = vpop.permute.xlu1 %719 }
 0x3dd   :  { %3523 = vmatprep.subr.msk.bf16.mxu1 %vm4177_vm6, %v3521_v4 }
 0x3e4   :  { %v3749_v6 = vpop.eup %3748 }
 0x3e5   :  { %v624_v9 = vsel %vm520_vm5, %v3749_v6, 0.0  ;;  %v3751_v10 = vpop.eup %3750 }
 0x3e6   :  { %625 = vadd.xlane.f32.xlu0 %v624_v9  ;;  %v627_v21 = vsel %vm520_vm5, %v3751_v10, 0.0 }
 0x3ea   :  { %628 = vadd.xlane.f32.xlu0 %v627_v21 }
 0x400   :  { %717 = vrot.lane.b32.xlu0 %v4173_v33, %s3847_s2 }
 0x473   :  { %v626_v22 = vpop.xlane.xlu0 %625 }
 0x474   :  { %3752 = vrcp.f32 %v626_v22 }
 0x477   :  { %v629_v23 = vpop.xlane.xlu0 %628 }
 0x478   :  { %3754 = vrcp.f32 %v629_v23 }
 0x47b   :  { %v718_v43 = vpop.permute.xlu0 %717 }
 0x47e   :  { %v3753_v29 = vpop.eup %3752 }
 0x47f   :  { %v632_v34 = vmul.f32 %v3753_v29, %v3749_v6 }
 0x481   :  { %3264 = vmatprep.mubr.msk.f32.mxu1 %vm520_vm5, %v632_v34 }
 0x482   :  { %v3755_v37 = vpop.eup %3754 }
 0x483   :  { %v633_v40 = vmul.f32 %v3755_v37, %v3751_v10 }
 0x485   :  { %3265 = vmatmul.mubr.msk.f32.vlgmr.msra.gmra.mrb[6].mxu1 %vm520_vm5, %v633_v40 }
 0x486   :  { %3526 = vmatpush3.bf16.xpose.msk.msra.mxu1 %vm4177_vm6, %v3521_v4  ;;  %3271 = vmatprep.mubr.msk.f32.mxu1 %vm520_vm5, %v718_v43 }
 0x48d   :  { %3272 = vmatmul.mubr.msk.f32.vlgmr.msra.gmra.mrb[8].mxu1 %vm520_vm5, %v720_v45 }
 0x558   :  { %v3266_v49 = vpop.f32.mrb[6].mxu1 }
 0x559   :  { %716 = vst.msk [vmem:[#allocation2 + $0x8] sm:$0xff] %vm520_vm5, %v3266_v49  ;;  %v706_v51 = vpop.f32.mrb[7].mxu1 }
 0x55a   :  { %715 = vst.msk [vmem:[#allocation2] sm:$0xff] %vm520_vm5, %v706_v51 }
 0x560   :  { %v3273_v54 = vpop.f32.mrb[8].mxu1 }
 0x561   :  { %v809_v55 = vmul.f32 0.25, %v3273_v54  ;;  %v799_v57 = vpop.f32.mrb[9].mxu1 }
 0x562   :  { %v808_v58 = vmul.f32 0.25, %v799_v57 }
 0x563   :  { %v811_v60 = vadd.f32 %v809_v55, %v4194_v41 }
 0x564   :  { %v810_v61 = vadd.f32 %v808_v58, %v4199_v46 }
 0x565   :  { %v815_v62 = vsel %vm520_vm5, %v811_v60, -inf }
 0x566   :  { %816 = vmax.xlane.f32.xlu0 %v815_v62  ;;  %v812_v63 = vsel %vm520_vm5, %v810_v61, -inf }
 0x567   :  { %813 = vmax.xlane.f32.xlu1 %v812_v63 }
 0x5f3   :  { %v817_v0 = vpop.xlane.xlu0 %816 }
 0x5f4   :  { %v819_v1 = vsub.f32 %v811_v60, %v817_v0  ;;  %v814_v2 = vpop.xlane.xlu1 %813 }
 0x5f5   :  { %v818_v3 = vsub.f32 %v810_v61, %v814_v2 }
 0x5f6   :  { %v822_v4 = vmul.f32 1.442695, %v819_v1 }
 0x5f7   :  { %v820_v6 = vmul.f32 1.442695, %v818_v3 }
 0x5f8   :  { %3756 = vpow2.f32 %v822_v4 }
 0x5f9   :  { %3758 = vpow2.f32 %v820_v6 }
 0x602   :  { %v3757_v9 = vpop.eup %3756 }
 0x603   :  { %v3759_v10 = vpop.eup %3758  ;;  %v827_v21 = vsel %vm520_vm5, %v3757_v9, 0.0 }
 0x604   :  { %828 = vadd.xlane.f32.xlu1 %v827_v21  ;;  %v824_v22 = vsel %vm520_vm5, %v3759_v10, 0.0 }
 0x605   :  { %825 = vadd.xlane.f32.xlu0 %v824_v22 }
 0x615   :  { %3691 = vrot.lane.b32.xlu1 %v4183_v39, %s3848_s23 }
 0x619   :  { %932 = vrot.lane.b32.xlu1 %v4173_v33, %s3848_s23 }
 0x61b   :  { %3686 = vrot.lane.b32.xlu0 %v4169_v27, %s3847_s2 }
 0x61f   :  { %934 = vrot.lane.b32.xlu0 %v4171_v28, %s3848_s23 }
 0x691   :  { %v829_v23 = vpop.xlane.xlu1 %828 }
 0x692   :  { %3760 = vrcp.f32 %v829_v23  ;;  %v826_v29 = vpop.xlane.xlu0 %825 }
 0x693   :  { %3762 = vrcp.f32 %v826_v29 }
 0x695   :  { %v3692_v34 = vpop.permute.xlu1 %3691 }
 0x696   :  { %v3687_v37 = vpop.permute.xlu0 %3686  ;;  %v3694_v40 = vunpack.i.h.bf16 %v3692_v34  ;;  %v3693_v43 = vunpack.i.l.bf16 %v3692_v34 }
 0x697   :  { %v3689_v45 = vunpack.i.h.bf16 %v3687_v37  ;;  %v3688_v49 = vunpack.i.l.bf16 %v3687_v37 }
 0x698   :  { %v3531_v54 = vpack.c.bf16 %v3694_v40, %v3693_v43 }
 0x699   :  { %v3527_v51 = vpack.c.bf16 %v3689_v45, %v3688_v49  ;;  %v933_v61 = vpop.permute.xlu1 %932 }
 0x69a   :  { %v935_v62 = vpop.permute.xlu0 %934 }
 0x69b   :  { %3528 = vmatprep.subr.bf16.mxu0 %v3527_v51 }
 0x69c   :  { %v3761_v55 = vpop.eup %3760  ;;  %3530 = vmatpush3.bf16.msra.mxu0 %v3527_v51 }
 0x69d   :  { %v3763_v57 = vpop.eup %3762  ;;  %3533 = vmatprep.subr.msk.bf16.mxu0 %vm4177_vm6, %v3531_v54  ;;  %v833_v60 = vmul.f32 %v3761_v55, %v3757_v9 }
 0x69e   :  { %v832_v58 = vmul.f32 %v3763_v57, %v3759_v10 }
 0x6a0   :  { %3278 = vmatprep.mubr.msk.f32.mxu0 %vm520_vm5, %v832_v58 }
 0x6a1   :  { %3279 = vmatmul.mubr.msk.f32.vlgmr.msra.gmra.mrb[4].mxu0 %vm520_vm5, %v833_v60 }
 0x6a2   :  { %3285 = vmatprep.mubr.msk.f32.mxu0 %vm520_vm5, %v933_v61 }
 0x6a5   :  { %3536 = vmatpush3.bf16.xpose.msk.msra.mxu0 %vm4177_vm6, %v3531_v54 }
 0x6ac   :  { %3286 = vmatmul.mubr.msk.f32.vlgmr.msra.gmra.mrb[6].mxu0 %vm520_vm5, %v935_v62 }
 0x774   :  { %v4245_v63 = vpop.f32.mrb[4].mxu0 }
 0x775   :  { %v4247_v0 = vpop.f32.mrb[5].mxu0 }
 0x77f   :  { %v3287_v1 = vpop.f32.mrb[6].mxu0 }
 0x780   :  { %v1024_v2 = vmul.f32 0.25, %v3287_v1  ;;  %v1014_v3 = vpop.f32.mrb[7].mxu0 }
 0x781   :  { %v1023_v4 = vmul.f32 0.25, %v1014_v3 }
 0x782   :  { %v1026_v6 = vadd.f32 %v1024_v2, %v4194_v41 }
 0x783   :  { %v1025_v9 = vadd.f32 %v1023_v4, %v4199_v46 }
 0x784   :  { %v1030_v10 = vsel %vm520_vm5, %v1026_v6, -inf }
 0x785   :  { %1031 = vmax.xlane.f32.xlu0 %v1030_v10  ;;  %v1027_v21 = vsel %vm520_vm5, %v1025_v9, -inf }
 0x786   :  { %1028 = vmax.xlane.f32.xlu1 %v1027_v21 }
 0x812   :  { %v1032_v22 = vpop.xlane.xlu0 %1031 }
 0x813   :  { %v1034_v23 = vsub.f32 %v1026_v6, %v1032_v22  ;;  %v1029_v29 = vpop.xlane.xlu1 %1028 }
 0x814   :  { %v1033_v34 = vsub.f32 %v1025_v9, %v1029_v29 }
 0x815   :  { %v1037_v37 = vmul.f32 1.442695, %v1034_v23 }
 0x816   :  { %v1035_v40 = vmul.f32 1.442695, %v1033_v34 }
 0x817   :  { %3764 = vpow2.f32 %v1037_v37 }
 0x818   :  { %3766 = vpow2.f32 %v1035_v40 }
 0x821   :  { %v3765_v43 = vpop.eup %3764 }
 0x822   :  { %v3767_v45 = vpop.eup %3766  ;;  %v1042_v49 = vsel %vm520_vm5, %v3765_v43, 0.0 }
 0x823   :  { %1043 = vadd.xlane.f32.xlu1 %v1042_v49  ;;  %v1039_v51 = vsel %vm520_vm5, %v3767_v45, 0.0 }
 0x824   :  { %1040 = vadd.xlane.f32.xlu0 %v1039_v51 }
 0x834   :  { %3701 = vrot.lane.b32.xlu1 %v4183_v39, %s3849_s0 }
 0x838   :  { %1147 = vrot.lane.b32.xlu1 %v4173_v33, %s3849_s0 }
 0x83a   :  { %3696 = vrot.lane.b32.xlu0 %v4169_v27, %s3848_s23 }
 0x83e   :  { %1149 = vrot.lane.b32.xlu0 %v4171_v28, %s3849_s0 }
 0x8b0   :  { %v1044_v54 = vpop.xlane.xlu1 %1043 }
 0x8b1   :  { %3768 = vrcp.f32 %v1044_v54  ;;  %v1041_v55 = vpop.xlane.xlu0 %1040 }
 0x8b2   :  { %3770 = vrcp.f32 %v1041_v55 }
 0x8b4   :  { %v3702_v57 = vpop.permute.xlu1 %3701 }
 0x8b5   :  { %v3697_v58 = vpop.permute.xlu0 %3696  ;;  %v3704_v60 = vunpack.i.h.bf16 %v3702_v57  ;;  %v3703_v61 = vunpack.i.l.bf16 %v3702_v57 }
 0x8b6   :  { %v3699_v62 = vunpack.i.h.bf16 %v3697_v58  ;;  %v3698_v1 = vunpack.i.l.bf16 %v3697_v58 }
 0x8b7   :  { %v3541_v2 = vpack.c.bf16 %v3704_v60, %v3703_v61 }
 0x8b8   :  { %v3537_v39 = vpack.c.bf16 %v3699_v62, %v3698_v1  ;;  %v1148_v6 = vpop.permute.xlu1 %1147 }
 0x8b9   :  { %v1150_v9 = vpop.permute.xlu0 %1149 }
 0x8ba   :  { %3538 = vmatprep.subr.bf16.mxu1 %v3537_v39 }
 0x8bb   :  { %v3769_v33 = vpop.eup %3768  ;;  %3540 = vmatpush3.bf16.msra.mxu1 %v3537_v39 }
 0x8bc   :  { %v3771_v3 = vpop.eup %3770  ;;  %3543 = vmatprep.subr.msk.bf16.mxu1 %vm4177_vm6, %v3541_v2  ;;  %v1048_v4 = vmul.f32 %v3769_v33, %v3765_v43 }
 0x8bd   :  { %v1047_v28 = vmul.f32 %v3771_v3, %v3767_v45 }
 0x8bf   :  { %3292 = vmatprep.mubr.msk.f32.mxu1 %vm520_vm5, %v1047_v28 }
 0x8c0   :  { %3293 = vmatmul.mubr.msk.f32.vlgmr.msra.gmra.mrb[10].mxu1 %vm520_vm5, %v1048_v4 }
 0x8c1   :  { %3299 = vmatprep.mubr.msk.f32.mxu1 %vm520_vm5, %v1148_v6 }
 0x8c4   :  { %3546 = vmatpush3.bf16.xpose.msk.msra.mxu1 %vm4177_vm6, %v3541_v2 }
 0x8c5   :  { %3568 = vmatprep.subr.bf16.mxu1 %v3935_v5 }
 0x8cb   :  { %3300 = vmatmul.mubr.msk.f32.vlgmr.msra.gmra.mrb[12].mxu1 %vm520_vm5, %v1150_v9 }
 0x8cc   :  { %3570 = vmatpush3.bf16.msra.mxu1 %v3935_v5 }
 0x8cd   :  { %3572 = vmatprep.subr.bf16.mxu1 %v3943_v8 }
 0x8d0   :  { %3574 = vmatpush3.bf16.msra.mxu1 %v3943_v8 }
 0x8d1   :  { %3576 = vmatprep.subr.bf16.mxu1 %v3959_v12 }
 0x993   :  { %v3294_v10 = vpop.f32.mrb[10].mxu1 }
 0x994   :  { %v1127_v21 = vpop.f32.mrb[11].mxu1 }
 0x99e   :  { %v3301_v22 = vpop.f32.mrb[12].mxu1 }
 0x99f   :  { %v1239_v23 = vmul.f32 0.25, %v3301_v22  ;;  %v1229_v29 = vpop.f32.mrb[13].mxu1  ;;  %v1381_v22 = vld [vmem:[%s4605_s10 + $0x8] sm:$0xff] }
 0x9a0   :  { %v1238_v34 = vmul.f32 0.25, %v1229_v29  ;;  %v1382_v29 = vld [vmem:[%s4605_s10 + $0x10] sm:$0xff] }
 0x9a1   :  { %v1241_v37 = vadd.f32 %v1239_v23, %v4194_v41 }
 0x9a2   :  { %v1240_v40 = vadd.f32 %v1238_v34, %v4199_v46  ;;  %v1383_v34 = vld [vmem:[%s4605_s10 + $0x18] sm:$0xff] }
 0x9a3   :  { %v1245_v43 = vsel %vm520_vm5, %v1241_v37, -inf }
 0x9a4   :  { %1246 = vmax.xlane.f32.xlu0 %v1245_v43  ;;  %v1242_v5 = vsel %vm520_vm5, %v1240_v40, -inf  ;;  %v1385_v43 = vld [vmem:[%s4605_s10 + $0x28] sm:$0xff] }
 0x9a5   :  { %1243 = vmax.xlane.f32.xlu1 %v1242_v5  ;;  %v1386_v5 = vld [vmem:[%s4605_s10 + $0x30] sm:$0xff] }
 0xa31   :  { %v1247_v45 = vpop.xlane.xlu0 %1246 }
 0xa32   :  { %v1249_v8 = vsub.f32 %v1241_v37, %v1247_v45  ;;  %v1244_v49 = vpop.xlane.xlu1 %1243  ;;  %v4312_v37 = vpack.c.bf16 %v1383_v34, %v1382_v29 }
 0xa33   :  { %v1248_v51 = vsub.f32 %v1240_v40, %v1244_v49  ;;  %v1384_v40 = vld [vmem:[%s4605_s10 + $0x20] sm:$0xff] }
 0xa34   :  { %v1252_v54 = vmul.f32 1.442695, %v1249_v8  ;;  %v4324_v45 = vpack.c.bf16 %v1385_v43, %v1384_v40  ;;  %v1387_v8 = vld [vmem:[%s4605_s10 + $0x38] sm:$0xff] }
 0xa35   :  { %v1250_v55 = vmul.f32 1.442695, %v1248_v51  ;;  %v4331_v49 = vpack.c.bf16 %v1387_v8, %v1386_v5 }
 0xa36   :  { %3772 = vpow2.f32 %v1252_v54 }
 0xa37   :  { %3774 = vpow2.f32 %v1250_v55  ;;  %v2991_v55 = vmul.f32 -1.442695, %v4111_v53 }
 0xa40   :  { %v3773_v57 = vpop.eup %3772 }
 0xa41   :  { %v3775_v58 = vpop.eup %3774  ;;  %v1257_v60 = vsel %vm520_vm5, %v3773_v57, 0.0 }
 0xa42   :  { %1258 = vadd.xlane.f32.xlu1 %v1257_v60  ;;  %v1254_v61 = vsel %vm520_vm5, %v3775_v58, 0.0 }
 0xa43   :  { %1255 = vadd.xlane.f32.xlu0 %v1254_v61 }
 0xa53   :  { %923 = vrot.lane.b32.xlu1 %v4247_v0, %s3850_s5 }
 0xa57   :  { %925 = vrot.lane.b32.xlu1 %v4245_v63, %s3850_s5 }
 0xa59   :  { %3706 = vrot.lane.b32.xlu0 %v4169_v27, %s3849_s0 }
 0xa5b   :  { %1140 = vrot.lane.b32.xlu1 %v3294_v10, %s3851_s1 }
 0xa5d   :  { %1138 = vrot.lane.b32.xlu0 %v1127_v21, %s3851_s1  ;;  %v1380_v21 = vld [vmem:[%s4605_s10] sm:$0xff] }
 0xa5e   :  { %v4302_v23 = vpack.c.bf16 %v1381_v22, %v1380_v21 }
 0xacf   :  { %v1259_v62 = vpop.xlane.xlu1 %1258 }
 0xad0   :  { %3776 = vrcp.f32 %v1259_v62  ;;  %v1256_v1 = vpop.xlane.xlu0 %1255 }
 0xad1   :  { %3778 = vrcp.f32 %v1256_v1 }
 0xad2   :  { %3780 = vpow2.f32 %v2991_v55  ;;  %v4371_v55 = vld [vmem:[%s4606_s11] ss:$0 sm:$0xff] }
 0xad3   :  { %v924_v39 = vpop.permute.xlu1 %923 }
 0xad4   :  { %930 = vst.msk [vmem:[#allocation2] sm:$0xff] %vm929_vm7, %v924_v39  ;;  %v3707_v0 = vpop.permute.xlu0 %3706 }
 0xad5   :  { %v3709_v2 = vunpack.i.h.bf16 %v3707_v0  ;;  %v3708_v33 = vunpack.i.l.bf16 %v3707_v0 }
 0xad7   :  { %v3547_v63 = vpack.c.bf16 %v3709_v2, %v3708_v33  ;;  %v926_v3 = vpop.permute.xlu1 %925 }
 0xad8   :  { %931 = vst.msk [vmem:[#allocation2 + $0x8] sm:$0xff] %vm929_vm7, %v926_v3  ;;  %v1139_v27 = vpop.permute.xlu0 %1138 }
 0xad9   :  { %1145 = vst.msk [vmem:[#allocation2] sm:$0xff] %vm1144_vm8, %v1139_v27  ;;  %3548 = vmatprep.subr.bf16.mxu0 %v3547_v63 }
 0xada   :  { %v3777_v28 = vpop.eup %3776  ;;  %3550 = vmatpush3.bf16.msra.mxu0 %v3547_v63 }
 0xadb   :  { %v3779_v4 = vpop.eup %3778  ;;  %v1141_v6 = vpop.permute.xlu1 %1140  ;;  %v1263_v10 = vmul.f32 %v3777_v28, %v3773_v57  ;;  %3552 = vmatprep.subr.bf16.mxu0 %v4302_v23  ;;  %v2992_v57 = vmul.f32 -1.442695, %v4109_v52 }
 0xadc   :  { %1146 = vst.msk [vmem:[#allocation2 + $0x8] sm:$0xff] %vm1144_vm8, %v1141_v6  ;;  %v1262_v9 = vmul.f32 %v3779_v4, %v3775_v58  ;;  %v3781_v58 = vpop.eup %3780 }
 0xadd   :  { %3782 = vpow2.f32 %v2992_v57  ;;  %v1370_v61 = vadd.f32 1.0, %v3781_v58 }
 0xade   :  { %3306 = vmatprep.mubr.msk.f32.mxu0 %vm520_vm5, %v1262_v9 }
 0xadf   :  { %3307 = vmatmul.mubr.msk.f32.vlgmr.msra.gmra.mrb[8].mxu0 %vm520_vm5, %v1263_v10  ;;  %3784 = vrcp.f32 %v1370_v61 }
 0xae0   :  { %3554 = vmatpush3.bf16.msra.mxu0 %v4302_v23 }
 0xae1   :  { %3556 = vmatprep.subr.bf16.mxu0 %v4312_v37 }
 0xae4   :  { %3558 = vmatpush3.bf16.msra.mxu0 %v4312_v37 }
 0xae5   :  { %3560 = vmatprep.subr.bf16.mxu0 %v4324_v45 }
 0xae7   :  { %v3783_v60 = vpop.eup %3782 }
 0xae8   :  { %3562 = vmatpush3.bf16.msra.mxu0 %v4324_v45  ;;  %v1371_v62 = vadd.f32 1.0, %v3783_v60 }
 0xae9   :  { %3564 = vmatprep.subr.bf16.mxu0 %v4331_v49  ;;  %v3785_v0 = vpop.eup %3784 }
 0xaea   :  { %3786 = vrcp.f32 %v1371_v62  ;;  %v1376_v33 = vmul.f32 %v3785_v0, %v4111_v53 }
 0xaec   :  { %3566 = vmatpush3.bf16.msra.mxu0 %v4331_v49 }
 0xaed   :  { %3584 = vmatprep.subr.bf16.mxu0 %v4038_v30 }
 0xaf4   :  { %v3787_v2 = vpop.eup %3786 }
 0xaf5   :  { %v1377_v3 = vmul.f32 %v3787_v2, %v4109_v52 }
 0xbb2   :  { %v3308_v51 = vpop.f32.mrb[8].mxu0 }
 0xbb3   :  { %1355 = vrot.lane.b32.xlu1 %v3308_v51, %s3852_s19  ;;  %v1342_v54 = vpop.f32.mrb[9].mxu0 }
 0xbb4   :  { %1353 = vrot.lane.b32.xlu0 %v1342_v54, %s3852_s19 }
 0xc25   :  { %v1356_v1 = vpop.permute.xlu1 %1355 }
 0xc26   :  { %1361 = vst.msk [vmem:[#allocation2 + $0x8] sm:$0xff] %vm1359_vm9, %v1356_v1  ;;  %v1354_v39 = vpop.permute.xlu0 %1353 }
 0xc27   :  { %1360 = vst.msk [vmem:[#allocation2] sm:$0xff] %vm1359_vm9, %v1354_v39 }
 0xc2d   :  { %v1363_v63 = vld [vmem:[#allocation2 + $0x8] sm:$0xff] }
 0xc2e   :  { %v1362_v27 = vld [vmem:[#allocation2] sm:$0xff]  ;;  %v1379_v4 = vmul.f32 %v1377_v3, %v1363_v63 }
 0xc2f   :  { %v1378_v28 = vmul.f32 %v1376_v33, %v1362_v27 }
 0xc31   :  { %3325 = vmatprep.mubr.msk.f32.mxu0 %vm355_vm4, %v1378_v28 }
 0xc32   :  { %3326 = vmatmul.mubr.msk.f32.vlgmr.msra.gmra.mrb[10].mxu0 %vm355_vm4, %v1379_v4 }
 0xc33   :  { %3586 = vmatpush3.bf16.msra.mxu0 %v4038_v30 }
 0xc34   :  { %3588 = vmatprep.subr.bf16.mxu0 %v4058_v36 }
 0xc37   :  { %3590 = vmatpush3.bf16.msra.mxu0 %v4058_v36 }
 0xc38   :  { %3592 = vmatprep.subr.bf16.mxu0 %v4078_v42 }
 0xc3b   :  { %3594 = vmatpush3.bf16.msra.mxu0 %v4078_v42 }
 0xc3c   :  { %3596 = vmatprep.subr.bf16.mxu0 %v4098_v48 }
 0xc3f   :  { %3598 = vmatpush3.bf16.msra.mxu0 %v4098_v48 }
 0xd05   :  { %v3327_v52 = vpop.f32.mrb[10].mxu0 }
 0xd06   :  { %v1470_v53 = vmul.f32 %v3327_v52, %v4013_v24  ;;  %v1460_v6 = vpop.f32.mrb[11].mxu0 }
 0xd07   :  { %v1469_v9 = vmul.f32 %v1460_v6, %v3997_v19 }
 0xd08   :  { %v1472_v30 = vadd.f32 %v1470_v53, %v4016_v25 }
 0xd09   :  { %v1471_v10 = vadd.f32 %v1469_v9, %v4000_v20 }
 0xd0a   :  { %v1476_v36 = vsel %vm69_vm0, %v1472_v30, 0.0 }
 0xd0b   :  { %1477 = vadd.xlane.f32.xlu1 %v1476_v36  ;;  %v1473_v21 = vsel %vm69_vm0, %v1471_v10, 0.0 }
 0xd0c   :  { %1474 = vadd.xlane.f32.xlu0 %v1473_v21 }
 0xd1c   :  { %1701 = vperm.xlu1 %3679, %v3973_v14  }
 0xd20   :  { %1728 = vperm.xlu1 %3679, %v3956_v11  }
 0xd24   :  { %1733 = vperm.xlu1 %3679, %v3985_v16  }
 0xd28   :  { %1760 = vperm.xlu1 %3679, %v3991_v17  }
 0xd98   :  { %v1478_v42 = vpop.xlane.xlu1 %1477 }
 0xd99   :  { %v1481_v48 = vmul.f32 0.03125, %v1478_v42  ;;  %v1475_v22 = vpop.xlane.xlu0 %1474 }
 0xd9a   :  { %v1480_v25 = vmul.f32 0.03125, %v1475_v22 }
 0xd9b   :  { %v1483_v29 = vsub.f32 %v1472_v30, %v1481_v48 }
 0xd9c   :  { %v1482_v20 = vsub.f32 %v1471_v10, %v1480_v25 }
 0xd9d   :  { %v1485_v43 = vmul.f32 %v1483_v29, %v1483_v29 }
 0xd9e   :  { %v1484_v34 = vmul.f32 %v1482_v20, %v1482_v20 }
 0xd9f   :  { %v1489_v5 = vsel %vm69_vm0, %v1485_v43, 0.0 }
 0xda0   :  { %v1486_v40 = vsel %vm69_vm0, %v1484_v34, 0.0 }
 0xda1   :  { %1487 = vadd.xlane.f32.xlu0 %v1486_v40 }
 0xda5   :  { %1490 = vadd.xlane.f32.xlu0 %v1489_v5 }
 0xdbb   :  { %1706 = vperm.xlu0 %3678, %v3979_v15   ;;  %v4376_v15 = vld [vmem:[%s4607_s12] ss:$0 sm:$0xff] }
 0xdbf   :  { %1755 = vperm.xlu0 %3678, %v3966_v13  }
 0xe2e   :  { %v1488_v11 = vpop.xlane.xlu0 %1487 }
 0xe2f   :  { %v1492_v14 = vmul.f32 0.03125, %v1488_v11 }
 0xe31   :  { %v1494_v16 = vadd.f32 1e-05, %v1492_v14 }
 0xe32   :  { %v1491_v17 = vpop.xlane.xlu0 %1490 }
 0xe33   :  { %3788 = vrsqrt.f32 %v1494_v16  ;;  %v1493_v8 = vmul.f32 0.03125, %v1491_v17 }
 0xe35   :  { %v1495_v51 = vadd.f32 1e-05, %v1493_v8 }
 0xe37   :  { %3790 = vrsqrt.f32 %v1495_v51 }
 0xe3a   :  { %v1707_v3 = vpop.permute.xlu0 %1706 }
 0xe3d   :  { %v3789_v54 = vpop.eup %3788 }
 0xe3e   :  { %v1498_v57 = vmul.f32 %v3789_v54, %v1482_v20  ;;  %v1756_v20 = vpop.permute.xlu0 %1755 }
 0xe40   :  { %v1506_v13 = vmul.f32 %v4371_v55, %v1498_v57 }
 0xe41   :  { %v3791_v58 = vpop.eup %3790 }
 0xe42   :  { %v1499_v60 = vmul.f32 %v3791_v58, %v1483_v29  ;;  %v1514_v61 = vadd.f32 %v4376_v15, %v1506_v13 }
 0xe44   :  { %v1507_v62 = vmul.f32 %v4371_v55, %v1499_v60  ;;  %v4382_v1 = vmul.f32 %v1514_v61, %v3997_v19 }
 0xe46   :  { %1518 = vst.msk [vmem:[%s4608_s13] sm:$0xff] %vm69_vm0, %v4382_v1  ;;  %3336 = vmatprep.mubr.msk.f32.mxu1 %vm69_vm0, %v4382_v1  ;;  %v1515_v39 = vadd.f32 %v4376_v15, %v1507_v62 }
 0xe48   :  { %v4393_v0 = vmul.f32 %v1515_v39, %v4013_v24 }
 0xe4a   :  { %1519 = vst.msk [vmem:[%s4608_s13 + $0x8] sm:$0xff] %vm69_vm0, %v4393_v0  ;;  %3337 = vmatmul.mubr.msk.f32.vlgmr.msra.gmra.mrb[14].mxu1 %vm69_vm0, %v4393_v0 }
 0xe4b   :  { %3578 = vmatpush3.bf16.msra.mxu1 %v3959_v12  ;;  %3347 = vmatprep.mubr.msk.f32.mxu1 %vm69_vm0, %v4382_v1  ;;  %v1702_v12 = vpop.permute.xlu1 %1701 }
 0xe4c   :  { %3580 = vmatprep.subr.bf16.mxu1 %v4018_v26 }
 0xe4f   :  { %3582 = vmatpush3.bf16.msra.mxu1 %v4018_v26  ;;  %v1729_v33 = vpop.permute.xlu1 %1728 }
 0xe50   :  { %3600 = vmatprep.subr.bf16.mxu1 %v4043_v32 }
 0xe52   :  { %3348 = vmatmul.mubr.msk.f32.vlgmr.msra.gmra.mrb[16].mxu1 %vm69_vm0, %v4393_v0 }
 0xe53   :  { %3602 = vmatpush3.bf16.msra.mxu1 %v4043_v32  ;;  %v1734_v63 = vpop.permute.xlu1 %1733 }
 0xe54   :  { %3604 = vmatprep.subr.bf16.mxu1 %v4063_v38 }
 0xe57   :  { %3606 = vmatpush3.bf16.msra.mxu1 %v4063_v38  ;;  %v1761_v29 = vpop.permute.xlu1 %1760 }
 0xe58   :  { %3608 = vmatprep.subr.bf16.mxu1 %v4083_v44 }
 0xe5b   :  { %3610 = vmatpush3.bf16.msra.mxu1 %v4083_v44 }
 0xe5c   :  { %3612 = vmatprep.subr.bf16.mxu1 %v4103_v50 }
 0xe5f   :  { %3614 = vmatpush3.bf16.msra.mxu1 %v4103_v50 }
 0xf1d   :  { %v4417_v26 = vpop.f32.mrb[14].mxu1 }
 0xf1e   :  { %v4419_v2 = vpop.f32.mrb[15].mxu1 }
 0xf25   :  { %v3349_v32 = vpop.f32.mrb[16].mxu1 }
 0xf26   :  { %v1694_v27 = vrot.slane %v3349_v32, 5  ;;  %v1721_v28 = vrot.slane %v3349_v32, 6  ;;  %v1675_v38 = vpop.f32.mrb[17].mxu1  ;;  %v1748_v4 = vrot.slane %v3349_v32, 7  ;;  %v1690_v6 = vmul.f32 %v3349_v32, %v4118_v59 }
 0xf27   :  { %v1693_v52 = vrot.slane %v1675_v38, 5  ;;  %v1720_v53 = vrot.slane %v1675_v38, 6  ;;  %v1747_v44 = vrot.slane %v1675_v38, 7  ;;  %v1689_v50 = vmul.f32 %v4118_v59, %v1675_v38 }
 0xf28   :  { %v1692_v34 = vadd.f32 %v4128_v7, %v1690_v6 }
 0xf29   :  { %v1695_v9 = vsel %vm249_vm1, %v1693_v52, %v1694_v27  ;;  %v1696_v30 = vsel %vm249_vm1, %v1694_v27, %v1693_v52  ;;  %v1722_v10 = vsel %vm277_vm2, %v1720_v53, %v1721_v28  ;;  %v1723_v42 = vsel %vm277_vm2, %v1721_v28, %v1720_v53 }
 0xf2a   :  { %v1709_v36 = vmul.f32 %v1702_v12, %v1696_v30  ;;  %v1710_v21 = vmul.f32 %v1707_v3, %v1695_v9  ;;  %v1737_v48 = vmul.f32 %v1734_v63, %v1722_v10  ;;  %v1736_v22 = vmul.f32 %v1729_v33, %v1723_v42 }
 0xf2b   :  { %v1749_v25 = vsel %vm306_vm3, %v1747_v44, %v1748_v4  ;;  %v1750_v59 = vsel %vm306_vm3, %v1748_v4, %v1747_v44  ;;  %v1691_v40 = vadd.f32 %v4128_v7, %v1689_v50 }
 0xf2c   :  { %v1716_v43 = vmul.f32 %v4137_v18, %v1709_v36  ;;  %v1717_v5 = vmul.f32 %v4137_v18, %v1710_v21  ;;  %v1763_v11 = vmul.f32 %v1756_v20, %v1750_v59  ;;  %v1764_v14 = vmul.f32 %v1761_v29, %v1749_v25 }
 0xf2d   :  { %v1743_v8 = vmul.f32 %v4146_v31, %v1736_v22  ;;  %v1744_v51 = vmul.f32 %v4146_v31, %v1737_v48 }
 0xf2e   :  { %v1718_v16 = vadd.f32 %v1716_v43, %v1691_v40  ;;  %v1719_v17 = vadd.f32 %v1717_v5, %v1692_v34  ;;  %v1770_v57 = vmul.f32 %v4159_v47, %v1763_v11  ;;  %v1771_v13 = vmul.f32 %v4159_v47, %v1764_v14 }
 0xf30   :  { %v1745_v56 = vadd.f32 %v1743_v8, %v1718_v16  ;;  %v1746_v54 = vadd.f32 %v1744_v51, %v1719_v17 }
 0xf32   :  { %v1772_v58 = vadd.f32 %v1770_v57, %v1745_v56  ;;  %v1773_v7 = vadd.f32 %v1771_v13, %v1746_v54 }
 0xf34   :  { %v3009_v60 = vmul.f32 -1.442695, %v1772_v58  ;;  %v3010_v61 = vmul.f32 -1.442695, %v1773_v7 }
 0xf36   :  { %3792 = vpow2.f32 %v3009_v60 }
 0xf37   :  { %3794 = vpow2.f32 %v3010_v61 }
 0xf40   :  { %v3793_v18 = vpop.eup %3792 }
 0xf41   :  { %v3795_v62 = vpop.eup %3794  ;;  %v1780_v39 = vadd.f32 1.0, %v3793_v18 }
 0xf42   :  { %v1781_v12 = vadd.f32 1.0, %v3795_v62 }
 0xf43   :  { %3796 = vrcp.f32 %v1780_v39 }
 0xf44   :  { %3798 = vrcp.f32 %v1781_v12 }
 0xf4d   :  { %v3797_v33 = vpop.eup %3796 }
 0xf4e   :  { %v3799_v31 = vpop.eup %3798  ;;  %v1786_v63 = vmul.f32 %v3797_v33, %v1772_v58 }
 0xf4f   :  { %v1787_v32 = vmul.f32 %v3799_v31, %v1773_v7 }
 0xf50   :  { %3366 = vmatprep.mubr.msk.f32.mxu0 %vm355_vm4, %v1786_v63  ;;  %3385 = vmatprep.mubr.msk.f32.mxu1 %vm355_vm4, %v1786_v63 }
 0xf51   :  { %3367 = vmatmul.mubr.msk.f32.vlgmr.msra.gmra.mrb[12].mxu0 %vm355_vm4, %v1787_v32  ;;  %3386 = vmatmul.mubr.msk.f32.vlgmr.msra.gmra.mrb[18].mxu1 %vm355_vm4, %v1787_v32  ;;  %v3621_v47 = vpack.c.bf16 %v1787_v32, %v1786_v63  ;;  %v4447_v3 = vpack.i.bf16 %v1787_v32, %v1786_v63 }
 0xf53   :  { %3622 = vmatprep.subr.bf16.mxu1 %v3621_v47 }
 0xf54   :  { %3624 = vmatpush3.bf16.msra.mxu1 %v3621_v47 }
0x1024   :  { %v4449_v27 = vpop.f32.mrb[12].mxu0  ;;  %v3387_v28 = vpop.f32.mrb[18].mxu1 }
0x1025   :  { %v4451_v38 = vpop.f32.mrb[13].mxu0  ;;  %v1951_v4 = vpop.f32.mrb[19].mxu1 }
0x1026   :  { %v3615_v52 = vpack.c.bf16 %v3387_v28, %v1951_v4  ;;  %3392 = vmatprep.mubr.msk.f32.mxu0 %vm520_vm5, %v4451_v38  ;;  %v4455_v53 = vpack.i.bf16 %v3387_v28, %v1951_v4 }
0x1028   :  { %3617 = vmatprep.subr.msk.bf16.mxu0 %vm4177_vm6, %v3615_v52 }
0x1029   :  { %3620 = vmatpush3.bf16.xpose.msk.msra.mxu0 %vm4177_vm6, %v3615_v52 }
0x1030   :  { %3393 = vmatmul.mubr.msk.f32.vlgmr.msra.gmra.mrb[14].mxu0 %vm520_vm5, %v4449_v27 }
0x1103   :  { %v3394_v44 = vpop.f32.mrb[14].mxu0 }
0x1104   :  { %v2048_v6 = vmul.f32 0.25, %v3394_v44  ;;  %v2038_v50 = vpop.f32.mrb[15].mxu0 }
0x1105   :  { %v2047_v9 = vmul.f32 0.25, %v2038_v50 }
0x1106   :  { %v2050_v30 = vadd.f32 %v2048_v6, %v4194_v41 }
0x1107   :  { %v2049_v10 = vadd.f32 %v2047_v9, %v4199_v46 }
0x1108   :  { %v2054_v36 = vsel %vm520_vm5, %v2050_v30, -inf }
0x1109   :  { %2055 = vmax.xlane.f32.xlu1 %v2054_v36  ;;  %v2051_v21 = vsel %vm520_vm5, %v2049_v10, -inf }
0x110a   :  { %2052 = vmax.xlane.f32.xlu0 %v2051_v21 }
0x111a   :  { %3711 = vrot.lane.b32.xlu1 %v4455_v53, %s3847_s2 }
0x111e   :  { %2158 = vrot.lane.b32.xlu1 %v4449_v27, %s3847_s2 }
0x1196   :  { %v2056_v42 = vpop.xlane.xlu1 %2055 }
0x1197   :  { %v2058_v48 = vsub.f32 %v2050_v30, %v2056_v42  ;;  %v2053_v22 = vpop.xlane.xlu0 %2052 }
0x1198   :  { %v2057_v25 = vsub.f32 %v2049_v10, %v2053_v22 }
0x1199   :  { %v2061_v59 = vmul.f32 1.442695, %v2058_v48 }
0x119a   :  { %v2059_v29 = vmul.f32 1.442695, %v2057_v25  ;;  %v3712_v20 = vpop.permute.xlu1 %3711 }
0x119b   :  { %v3714_v34 = vunpack.i.h.bf16 %v3712_v20  ;;  %v3713_v40 = vunpack.i.l.bf16 %v3712_v20 }
0x119c   :  { %3800 = vpow2.f32 %v2059_v29 }
0x119d   :  { %v3625_v43 = vpack.c.bf16 %v3714_v34, %v3713_v40  ;;  %3802 = vpow2.f32 %v2061_v59 }
0x119e   :  { %v2159_v58 = vpop.permute.xlu1 %2158 }
0x119f   :  { %3627 = vmatprep.subr.msk.bf16.mxu1 %vm4177_vm6, %v3625_v43 }
0x11a6   :  { %v3801_v5 = vpop.eup %3800 }
0x11a7   :  { %v2063_v11 = vsel %vm520_vm5, %v3801_v5, 0.0  ;;  %v3803_v14 = vpop.eup %3802 }
0x11a8   :  { %2064 = vadd.xlane.f32.xlu0 %v2063_v11  ;;  %v2066_v16 = vsel %vm520_vm5, %v3803_v14, 0.0 }
0x11ac   :  { %2067 = vadd.xlane.f32.xlu0 %v2066_v16 }
0x11c2   :  { %2156 = vrot.lane.b32.xlu0 %v4451_v38, %s3847_s2 }
0x1235   :  { %v2065_v17 = vpop.xlane.xlu0 %2064 }
0x1236   :  { %3804 = vrcp.f32 %v2065_v17 }
0x1239   :  { %v2068_v8 = vpop.xlane.xlu0 %2067 }
0x123a   :  { %3806 = vrcp.f32 %v2068_v8 }
0x123d   :  { %v2157_v13 = vpop.permute.xlu0 %2156 }
0x1240   :  { %v3805_v51 = vpop.eup %3804 }
0x1241   :  { %v2071_v56 = vmul.f32 %v3805_v51, %v3801_v5 }
0x1243   :  { %3399 = vmatprep.mubr.msk.f32.mxu1 %vm520_vm5, %v2071_v56  ;;  %v3844_v56 = vld [vmem:[%s4604_s3 + $0x8] sm:$0xff] }
0x1244   :  { %v3807_v54 = vpop.eup %3806 }
0x1245   :  { %v2072_v57 = vmul.f32 %v3807_v54, %v3803_v14 }
0x1247   :  { %3400 = vmatmul.mubr.msk.f32.vlgmr.msra.gmra.mrb[20].mxu1 %vm520_vm5, %v2072_v57  ;;  %v3845_v57 = vld [vmem:[%s4604_s3] sm:$0xff] }
0x1248   :  { %3630 = vmatpush3.bf16.xpose.msk.msra.mxu1 %vm4177_vm6, %v3625_v43  ;;  %3406 = vmatprep.mubr.msk.f32.mxu1 %vm520_vm5, %v2157_v13 }
0x124f   :  { %3407 = vmatmul.mubr.msk.f32.vlgmr.msra.gmra.mrb[22].mxu1 %vm520_vm5, %v2159_v58 }
0x131a   :  { %v3401_v7 = vpop.f32.mrb[20].mxu1 }
0x131b   :  { %2155 = vst.msk [vmem:[#allocation2 + $0x8] sm:$0xff] %vm520_vm5, %v3401_v7  ;;  %v2145_v60 = vpop.f32.mrb[21].mxu1 }
0x131c   :  { %2154 = vst.msk [vmem:[#allocation2] sm:$0xff] %vm520_vm5, %v2145_v60 }
0x1322   :  { %v3408_v61 = vpop.f32.mrb[22].mxu1 }
0x1323   :  { %v2248_v18 = vmul.f32 0.25, %v3408_v61  ;;  %v2238_v62 = vpop.f32.mrb[23].mxu1 }
0x1324   :  { %v2247_v39 = vmul.f32 0.25, %v2238_v62 }
0x1325   :  { %v2250_v12 = vadd.f32 %v2248_v18, %v4194_v41 }
0x1326   :  { %v2249_v33 = vadd.f32 %v2247_v39, %v4199_v46 }
0x1327   :  { %v2254_v31 = vsel %vm520_vm5, %v2250_v12, -inf }
0x1328   :  { %2255 = vmax.xlane.f32.xlu0 %v2254_v31  ;;  %v2251_v63 = vsel %vm520_vm5, %v2249_v33, -inf }
0x1329   :  { %2252 = vmax.xlane.f32.xlu1 %v2251_v63 }
0x13b5   :  { %v2256_v32 = vpop.xlane.xlu0 %2255 }
0x13b6   :  { %v2258_v47 = vsub.f32 %v2250_v12, %v2256_v32  ;;  %v2253_v28 = vpop.xlane.xlu1 %2252 }
0x13b7   :  { %v2257_v4 = vsub.f32 %v2249_v33, %v2253_v28 }
0x13b8   :  { %v2261_v52 = vmul.f32 1.442695, %v2258_v47 }
0x13b9   :  { %v2259_v44 = vmul.f32 1.442695, %v2257_v4 }
0x13ba   :  { %3808 = vpow2.f32 %v2261_v52 }
0x13bb   :  { %3810 = vpow2.f32 %v2259_v44 }
0x13c4   :  { %v3809_v6 = vpop.eup %3808 }
0x13c5   :  { %v3811_v50 = vpop.eup %3810  ;;  %v2266_v41 = vsel %vm520_vm5, %v3809_v6, 0.0 }
0x13c6   :  { %2267 = vadd.xlane.f32.xlu1 %v2266_v41  ;;  %v2263_v46 = vsel %vm520_vm5, %v3811_v50, 0.0 }
0x13c7   :  { %2264 = vadd.xlane.f32.xlu0 %v2263_v46 }
0x13d7   :  { %3721 = vrot.lane.b32.xlu1 %v4455_v53, %s3848_s23 }
0x13db   :  { %2370 = vrot.lane.b32.xlu1 %v4451_v38, %s3848_s23 }
0x13dd   :  { %3716 = vrot.lane.b32.xlu0 %v4447_v3, %s3847_s2 }
0x13e1   :  { %2372 = vrot.lane.b32.xlu0 %v4449_v27, %s3848_s23 }
0x1453   :  { %v2268_v9 = vpop.xlane.xlu1 %2267 }
0x1454   :  { %3812 = vrcp.f32 %v2268_v9  ;;  %v2265_v30 = vpop.xlane.xlu0 %2264 }
0x1455   :  { %3814 = vrcp.f32 %v2265_v30 }
0x1457   :  { %v3722_v10 = vpop.permute.xlu1 %3721 }
0x1458   :  { %v3717_v36 = vpop.permute.xlu0 %3716  ;;  %v3724_v21 = vunpack.i.h.bf16 %v3722_v10  ;;  %v3723_v42 = vunpack.i.l.bf16 %v3722_v10 }
0x1459   :  { %v3719_v48 = vunpack.i.h.bf16 %v3717_v36  ;;  %v3718_v22 = vunpack.i.l.bf16 %v3717_v36 }
0x145a   :  { %v3635_v59 = vpack.c.bf16 %v3724_v21, %v3723_v42 }
0x145b   :  { %v3631_v25 = vpack.c.bf16 %v3719_v48, %v3718_v22  ;;  %v2371_v43 = vpop.permute.xlu1 %2370 }
0x145c   :  { %v2373_v5 = vpop.permute.xlu0 %2372 }
0x145d   :  { %3632 = vmatprep.subr.bf16.mxu0 %v3631_v25 }
0x145e   :  { %v3813_v29 = vpop.eup %3812  ;;  %3634 = vmatpush3.bf16.msra.mxu0 %v3631_v25 }
0x145f   :  { %v3815_v20 = vpop.eup %3814  ;;  %3637 = vmatprep.subr.msk.bf16.mxu0 %vm4177_vm6, %v3635_v59  ;;  %v2272_v40 = vmul.f32 %v3813_v29, %v3809_v6 }
0x1460   :  { %v2271_v34 = vmul.f32 %v3815_v20, %v3811_v50 }
0x1462   :  { %3413 = vmatprep.mubr.msk.f32.mxu0 %vm520_vm5, %v2271_v34 }
0x1463   :  { %3414 = vmatmul.mubr.msk.f32.vlgmr.msra.gmra.mrb[16].mxu0 %vm520_vm5, %v2272_v40 }
0x1464   :  { %3420 = vmatprep.mubr.msk.f32.mxu0 %vm520_vm5, %v2371_v43 }
0x1467   :  { %3640 = vmatpush3.bf16.xpose.msk.msra.mxu0 %vm4177_vm6, %v3635_v59 }
0x146e   :  { %3421 = vmatmul.mubr.msk.f32.vlgmr.msra.gmra.mrb[18].mxu0 %vm520_vm5, %v2373_v5 }
0x1536   :  { %v4507_v11 = vpop.f32.mrb[16].mxu0 }
0x1537   :  { %v4509_v14 = vpop.f32.mrb[17].mxu0 }
0x1541   :  { %v3422_v16 = vpop.f32.mrb[18].mxu0 }
0x1542   :  { %v2462_v17 = vmul.f32 0.25, %v3422_v16  ;;  %v2452_v8 = vpop.f32.mrb[19].mxu0 }
0x1543   :  { %v2461_v51 = vmul.f32 0.25, %v2452_v8 }
0x1544   :  { %v2464_v54 = vadd.f32 %v3844_v56, %v2462_v17 }
0x1545   :  { %v2463_v13 = vadd.f32 %v3845_v57, %v2461_v51 }
0x1546   :  { %v2468_v58 = vsel %vm520_vm5, %v2464_v54, -inf }
0x1547   :  { %2469 = vmax.xlane.f32.xlu0 %v2468_v58  ;;  %v2465_v7 = vsel %vm520_vm5, %v2463_v13, -inf }
0x1548   :  { %2466 = vmax.xlane.f32.xlu1 %v2465_v7 }
0x15d4   :  { %v2470_v60 = vpop.xlane.xlu0 %2469 }
0x15d5   :  { %v2472_v61 = vsub.f32 %v2464_v54, %v2470_v60  ;;  %v2467_v18 = vpop.xlane.xlu1 %2466 }
0x15d6   :  { %v2471_v62 = vsub.f32 %v2463_v13, %v2467_v18 }
0x15d7   :  { %v2475_v39 = vmul.f32 1.442695, %v2472_v61 }
0x15d8   :  { %v2473_v12 = vmul.f32 1.442695, %v2471_v62 }
0x15d9   :  { %3816 = vpow2.f32 %v2475_v39 }
0x15da   :  { %3818 = vpow2.f32 %v2473_v12 }
0x15e3   :  { %v3817_v33 = vpop.eup %3816 }
0x15e4   :  { %v3819_v31 = vpop.eup %3818  ;;  %v2480_v63 = vsel %vm520_vm5, %v3817_v33, 0.0 }
0x15e5   :  { %2481 = vadd.xlane.f32.xlu1 %v2480_v63  ;;  %v2477_v32 = vsel %vm520_vm5, %v3819_v31, 0.0 }
0x15e6   :  { %2478 = vadd.xlane.f32.xlu0 %v2477_v32 }
0x15f6   :  { %3731 = vrot.lane.b32.xlu1 %v4455_v53, %s3849_s0 }
0x15fa   :  { %2584 = vrot.lane.b32.xlu1 %v4451_v38, %s3849_s0 }
0x15fc   :  { %3726 = vrot.lane.b32.xlu0 %v4447_v3, %s3848_s23 }
0x1600   :  { %2586 = vrot.lane.b32.xlu0 %v4449_v27, %s3849_s0 }
0x1672   :  { %v2482_v47 = vpop.xlane.xlu1 %2481 }
0x1673   :  { %3820 = vrcp.f32 %v2482_v47  ;;  %v2479_v28 = vpop.xlane.xlu0 %2478  ;;  %v3040_v47 = vmul.f32 -1.442695, %v4417_v26 }
0x1674   :  { %3822 = vrcp.f32 %v2479_v28 }
0x1676   :  { %v3732_v4 = vpop.permute.xlu1 %3731 }
0x1677   :  { %v3727_v52 = vpop.permute.xlu0 %3726  ;;  %v3734_v44 = vunpack.i.h.bf16 %v3732_v4  ;;  %v3733_v6 = vunpack.i.l.bf16 %v3732_v4 }
0x1678   :  { %v3729_v50 = vunpack.i.h.bf16 %v3727_v52  ;;  %v3728_v41 = vunpack.i.l.bf16 %v3727_v52 }
0x1679   :  { %v3645_v46 = vpack.c.bf16 %v3734_v44, %v3733_v6 }
0x167a   :  { %v3641_v53 = vpack.c.bf16 %v3729_v50, %v3728_v41  ;;  %v2585_v10 = vpop.permute.xlu1 %2584 }
0x167b   :  { %v2587_v36 = vpop.permute.xlu0 %2586 }
0x167c   :  { %3642 = vmatprep.subr.bf16.mxu1 %v3641_v53 }
0x167d   :  { %v3821_v38 = vpop.eup %3820  ;;  %3644 = vmatpush3.bf16.msra.mxu1 %v3641_v53 }
0x167e   :  { %v3823_v9 = vpop.eup %3822  ;;  %3647 = vmatprep.subr.msk.bf16.mxu1 %vm4177_vm6, %v3645_v46  ;;  %v2486_v30 = vmul.f32 %v3821_v38, %v3817_v33 }
0x167f   :  { %v2485_v27 = vmul.f32 %v3823_v9, %v3819_v31 }
0x1681   :  { %3427 = vmatprep.mubr.msk.f32.mxu1 %vm520_vm5, %v2485_v27 }
0x1682   :  { %3428 = vmatmul.mubr.msk.f32.vlgmr.msra.gmra.mrb[24].mxu1 %vm520_vm5, %v2486_v30 }
0x1683   :  { %3434 = vmatprep.mubr.msk.f32.mxu1 %vm520_vm5, %v2585_v10 }
0x1686   :  { %3650 = vmatpush3.bf16.xpose.msk.msra.mxu1 %vm4177_vm6, %v3645_v46 }
0x168d   :  { %3435 = vmatmul.mubr.msk.f32.vlgmr.msra.gmra.mrb[26].mxu1 %vm520_vm5, %v2587_v36 }
0x1755   :  { %v3429_v21 = vpop.f32.mrb[24].mxu1 }
0x1756   :  { %v2565_v42 = vpop.f32.mrb[25].mxu1 }
0x1760   :  { %v3436_v48 = vpop.f32.mrb[26].mxu1 }
0x1761   :  { %v2676_v22 = vmul.f32 0.25, %v3436_v48  ;;  %v2666_v25 = vpop.f32.mrb[27].mxu1 }
0x1762   :  { %v2675_v59 = vmul.f32 0.25, %v2666_v25 }
0x1763   :  { %v2678_v29 = vadd.f32 %v3844_v56, %v2676_v22 }
0x1764   :  { %v2677_v20 = vadd.f32 %v3845_v57, %v2675_v59 }
0x1765   :  { %v2682_v34 = vsel %vm520_vm5, %v2678_v29, -inf }
0x1766   :  { %2683 = vmax.xlane.f32.xlu0 %v2682_v34  ;;  %v2679_v40 = vsel %vm520_vm5, %v2677_v20, -inf }
0x1767   :  { %2680 = vmax.xlane.f32.xlu1 %v2679_v40 }
0x17f3   :  { %v2684_v43 = vpop.xlane.xlu0 %2683 }
0x17f4   :  { %v2686_v35 = vsub.f32 %v2678_v29, %v2684_v43  ;;  %v2681_v5 = vpop.xlane.xlu1 %2680 }
0x17f5   :  { %v2685_v16 = vsub.f32 %v2677_v20, %v2681_v5 }
0x17f6   :  { %v2689_v17 = vmul.f32 1.442695, %v2686_v35 }
0x17f7   :  { %v2687_v8 = vmul.f32 1.442695, %v2685_v16 }
0x17f8   :  { %3824 = vpow2.f32 %v2689_v17 }
0x17f9   :  { %3826 = vpow2.f32 %v2687_v8 }
0x1802   :  { %v3825_v51 = vpop.eup %3824 }
0x1803   :  { %v3827_v54 = vpop.eup %3826  ;;  %v2694_v13 = vsel %vm520_vm5, %v3825_v51, 0.0 }
0x1804   :  { %2695 = vadd.xlane.f32.xlu1 %v2694_v13  ;;  %v2691_v56 = vsel %vm520_vm5, %v3827_v54, 0.0 }
0x1805   :  { %2692 = vadd.xlane.f32.xlu0 %v2691_v56 }
0x1815   :  { %2362 = vrot.lane.b32.xlu1 %v4509_v14, %s3850_s5 }
0x1819   :  { %2364 = vrot.lane.b32.xlu1 %v4507_v11, %s3850_s5 }
0x181b   :  { %3736 = vrot.lane.b32.xlu0 %v4447_v3, %s3849_s0 }
0x181d   :  { %2578 = vrot.lane.b32.xlu1 %v3429_v21, %s3851_s1 }
0x181f   :  { %2576 = vrot.lane.b32.xlu0 %v2565_v42, %s3851_s1 }
0x1891   :  { %v2696_v57 = vpop.xlane.xlu1 %2695 }
0x1892   :  { %3828 = vrcp.f32 %v2696_v57  ;;  %v2693_v58 = vpop.xlane.xlu0 %2692 }
0x1893   :  { %3830 = vrcp.f32 %v2693_v58 }
0x1895   :  { %v2363_v7 = vpop.permute.xlu1 %2362 }
0x1896   :  { %2368 = vst.msk [vmem:[#allocation2] sm:$0xff] %vm929_vm7, %v2363_v7  ;;  %v3737_v60 = vpop.permute.xlu0 %3736 }
0x1897   :  { %v3739_v61 = vunpack.i.h.bf16 %v3737_v60  ;;  %v3738_v14 = vunpack.i.l.bf16 %v3737_v60 }
0x1899   :  { %v3651_v18 = vpack.c.bf16 %v3739_v61, %v3738_v14  ;;  %v2365_v62 = vpop.permute.xlu1 %2364 }
0x189a   :  { %2369 = vst.msk [vmem:[#allocation2 + $0x8] sm:$0xff] %vm929_vm7, %v2365_v62  ;;  %v2577_v11 = vpop.permute.xlu0 %2576 }
0x189b   :  { %2582 = vst.msk [vmem:[#allocation2] sm:$0xff] %vm1144_vm8, %v2577_v11  ;;  %3652 = vmatprep.subr.bf16.mxu0 %v3651_v18 }
0x189c   :  { %v3829_v3 = vpop.eup %3828  ;;  %3654 = vmatpush3.bf16.msra.mxu0 %v3651_v18 }
0x189d   :  { %v3831_v39 = vpop.eup %3830  ;;  %v2579_v12 = vpop.permute.xlu1 %2578  ;;  %3656 = vmatprep.subr.bf16.mxu0 %v4302_v23  ;;  %v2700_v31 = vmul.f32 %v3829_v3, %v3825_v51 }
0x189e   :  { %2583 = vst.msk [vmem:[#allocation2 + $0x8] sm:$0xff] %vm1144_vm8, %v2579_v12  ;;  %v2699_v33 = vmul.f32 %v3831_v39, %v3827_v54 }
0x18a0   :  { %3441 = vmatprep.mubr.msk.f32.mxu0 %vm520_vm5, %v2699_v33 }
0x18a1   :  { %3442 = vmatmul.mubr.msk.f32.vlgmr.msra.gmra.mrb[20].mxu0 %vm520_vm5, %v2700_v31 }
0x18a2   :  { %3658 = vmatpush3.bf16.msra.mxu0 %v4302_v23  ;;  %v3039_v23 = vmul.f32 -1.442695, %v4419_v2 }
0x18a3   :  { %3660 = vmatprep.subr.bf16.mxu0 %v4312_v37 }
0x18a4   :  { %3832 = vpow2.f32 %v3039_v23 }
0x18a5   :  { %3834 = vpow2.f32 %v3040_v47 }
0x18a6   :  { %3662 = vmatpush3.bf16.msra.mxu0 %v4312_v37 }
0x18a7   :  { %3664 = vmatprep.subr.bf16.mxu0 %v4324_v45 }
0x18aa   :  { %3666 = vmatpush3.bf16.msra.mxu0 %v4324_v45 }
0x18ab   :  { %3668 = vmatprep.subr.bf16.mxu0 %v4331_v49 }
0x18ae   :  { %3670 = vmatpush3.bf16.msra.mxu0 %v4331_v49  ;;  %v3833_v37 = vpop.eup %3832 }
0x18af   :  { %v3835_v28 = vpop.eup %3834  ;;  %v2806_v4 = vadd.f32 1.0, %v3833_v37 }
0x18b0   :  { %v2807_v45 = vadd.f32 1.0, %v3835_v28 }
0x18b1   :  { %3836 = vrcp.f32 %v2806_v4 }
0x18b2   :  { %3838 = vrcp.f32 %v2807_v45 }
0x18bb   :  { %v3837_v44 = vpop.eup %3836 }
0x18bc   :  { %v3839_v6 = vpop.eup %3838  ;;  %v2812_v50 = vmul.f32 %v3837_v44, %v4419_v2 }
0x18bd   :  { %v2813_v53 = vmul.f32 %v3839_v6, %v4417_v26 }
0x1974   :  { %v3443_v63 = vpop.f32.mrb[20].mxu0 }
0x1975   :  { %2792 = vrot.lane.b32.xlu1 %v3443_v63, %s3852_s19  ;;  %v2779_v32 = vpop.f32.mrb[21].mxu0 }
0x1976   :  { %2790 = vrot.lane.b32.xlu0 %v2779_v32, %s3852_s19 }
0x19e7   :  { %v2793_v52 = vpop.permute.xlu1 %2792 }
0x19e8   :  { %2797 = vst.msk [vmem:[#allocation2 + $0x8] sm:$0xff] %vm1359_vm9, %v2793_v52  ;;  %v2791_v49 = vpop.permute.xlu0 %2790 }
0x19e9   :  { %2796 = vst.msk [vmem:[#allocation2] sm:$0xff] %vm1359_vm9, %v2791_v49 }
0x19ef   :  { %v2799_v41 = vld [vmem:[#allocation2 + $0x8] sm:$0xff] }
0x19f0   :  { %v2798_v46 = vld [vmem:[#allocation2] sm:$0xff]  ;;  %v2815_v9 = vmul.f32 %v2813_v53, %v2799_v41 }
0x19f1   :  { %v2814_v38 = vmul.f32 %v2812_v50, %v2798_v46 }
0x19f3   :  { %3460 = vmatprep.mubr.msk.f32.mxu0 %vm355_vm4, %v2814_v38 }
0x19f4   :  { %3461 = vmatmul.mubr.msk.f32.vlgmr.msra.gmra.mrb[22].mxu0 %vm355_vm4, %v2815_v9 }
0x1ac7   :  { %v3462_v27 = vpop.f32.mrb[22].mxu0 }
0x1ac8   :  { %v2906_v30 = vmul.f32 %v3462_v27, %v4013_v24  ;;  %v2896_v10 = vpop.f32.mrb[23].mxu0 }
0x1ac9   :  { %v2905_v36 = vmul.f32 %v2896_v10, %v3997_v19 }
0x1aca   :  { %v2908_v21 = vadd.f32 %v2906_v30, %v4393_v0 }
0x1acb   :  { %v2907_v2 = vadd.f32 %v2905_v36, %v4382_v1 }
0x1acc   :  { %v2912_v42 = vsel %vm69_vm0, %v2908_v21, 0.0 }
0x1acd   :  { %2913 = vadd.xlane.f32.xlu1 %v2912_v42  ;;  %v2909_v26 = vsel %vm69_vm0, %v2907_v2, 0.0 }
0x1ace   :  { %2910 = vadd.xlane.f32.xlu0 %v2909_v26 }
0x1b5a   :  { %v2914_v48 = vpop.xlane.xlu1 %2913 }
0x1b5b   :  { %v2916_v22 = vmul.f32 0.03125, %v2914_v48  ;;  %v2911_v25 = vpop.xlane.xlu0 %2910 }
0x1b5c   :  { %v2915_v59 = vmul.f32 0.03125, %v2911_v25 }
0x1b5d   :  { %v2918_v29 = vsub.f32 %v2908_v21, %v2916_v22 }
0x1b5e   :  { %v2917_v20 = vsub.f32 %v2907_v2, %v2915_v59 }
0x1b5f   :  { %v2920_v43 = vmul.f32 %v2918_v29, %v2918_v29 }
0x1b60   :  { %v2919_v34 = vmul.f32 %v2917_v20, %v2917_v20 }
0x1b61   :  { %v2924_v0 = vsel %vm69_vm0, %v2920_v43, 0.0 }
0x1b62   :  { %v2921_v40 = vsel %vm69_vm0, %v2919_v34, 0.0 }
0x1b63   :  { %2922 = vadd.xlane.f32.xlu0 %v2921_v40 }
0x1b67   :  { %2925 = vadd.xlane.f32.xlu0 %v2924_v0 }
0x1bf0   :  { %v2923_v1 = vpop.xlane.xlu0 %2922 }
0x1bf1   :  { %v2927_v35 = vmul.f32 0.03125, %v2923_v1 }
0x1bf3   :  { %v2929_v5 = vadd.f32 1e-05, %v2927_v35 }
0x1bf4   :  { %v2926_v16 = vpop.xlane.xlu0 %2925 }
0x1bf5   :  { %3840 = vrsqrt.f32 %v2929_v5  ;;  %v2928_v17 = vmul.f32 0.03125, %v2926_v16 }
0x1bf7   :  { %v2930_v8 = vadd.f32 1e-05, %v2928_v17 }
0x1bf9   :  { %3842 = vrsqrt.f32 %v2930_v8 }
0x1bff   :  { %v3841_v51 = vpop.eup %3840 }
0x1c00   :  { %v2933_v54 = vmul.f32 %v3841_v51, %v2917_v20 }
0x1c02   :  { %v2935_v13 = vmul.f32 %v4371_v55, %v2933_v54 }
0x1c03   :  { %v3843_v56 = vpop.eup %3842 }
0x1c04   :  { %v2937_v57 = vadd.f32 %v4376_v15, %v2935_v13  ;;  %v2934_v58 = vmul.f32 %v3843_v56, %v2918_v29 }
0x1c06   :  { %v2939_v7 = vmul.f32 %v2937_v57, %v3997_v19  ;;  %v2936_v60 = vmul.f32 %v4371_v55, %v2934_v58 }
0x1c08   :  { %3043 = vst.msk [vmem:[%s4608_s13 + $0x10] sm:$0xff] %vm69_vm0, %v2939_v7  ;;  %v2938_v61 = vadd.f32 %v4376_v15, %v2936_v60 }
0x1c0a   :  { %v2940_v14 = vmul.f32 %v2938_v61, %v4013_v24 }
0x1c0c   :  { %3044 = vst.msk [vmem:[%s4608_s13 + $0x18] sm:$0xff] %vm69_vm0, %v2940_v14 }

</bundles_post_ra>
